<compile_context>
chip_gen: v7x
topology: tpu7x:2x2x1
jax: 0.10.0
libtpu: 0.0.40
codegen_flags: <defaults>
</compile_context>

<pallas_src>
import functools

import jax
import jax.numpy as jnp
from jax.experimental import pallas as pl
from jax.experimental.pallas import tpu as pltpu


# ----------------------------- Pallas kernel --------------------------------
def _make_kernel(num_layers: int, hidden_dim: int, output_dim: int,
                 batch: int, seq_len: int, fc1_dim: int = 64):
    L, H, B, S, OUT, F1 = num_layers, hidden_dim, batch, seq_len, output_dim, fc1_dim

    def kernel(xt_ref, bn_ref, fc1_w_ref, w_ih0_ref, rec_w_ref, fc2_w_ref,
               bias_ref, out_ref):
        f32 = jnp.float32
        bf16 = jnp.bfloat16

        # --- BatchNorm1d (eval mode; channel axis = S, leading in time-major) + ReLU
        x = xt_ref[...].astype(f32)                       # (S, B, D)
        bn = bn_ref[...]                                  # (2S, 1, 1): [scale; shift]
        x = jnp.maximum(x * bn[0:S] + bn[S:2 * S], 0.0)

        # --- fc1 + ReLU: single (S*B, D) x (D, 64) matmul, bf16 operands, f32 acc
        D = x.shape[-1]
        fc1_b = bias_ref[0:1, 0:F1]                       # (1, 64)
        seq = jnp.maximum(
            jnp.dot(x.reshape(S * B, D).astype(bf16), fc1_w_ref[...],
                    preferred_element_type=f32) + fc1_b, 0.0)        # (S*B, 64) f32

        # --- hoisted layer-0 input projection (off the serial recurrence chain)
        b0 = bias_ref[2:3, 0:4 * H]                       # (1, 4H)
        gates_in0 = jnp.dot(seq.astype(bf16), w_ih0_ref[...],
                            preferred_element_type=f32) + b0         # (S*B, 4H) f32

        # --- recurrent weights (bf16) / biases (f32), loaded once
        w_hh = [rec_w_ref[l] for l in range(L)]                       # (H, 4H) each
        w_ih = [None] + [rec_w_ref[L + l - 1] for l in range(1, L)]   # layers 1..L-1
        b_l = [bias_ref[2 + l:3 + l, 0:4 * H] for l in range(L)]      # (1, 4H) each

        # --- constant lane mask: tanh on g quadrant, sigmoid on i/f/o quadrants
        lane = jax.lax.broadcasted_iota(jnp.int32, (B, 4 * H), 1)
        g_mask = (lane >= 2 * H) & (lane < 3 * H)

        # --- stacked LSTM, wavefront-scheduled over (layer, time) diagonals so the
        #     dependent-cell chain is S + L - 1 instead of S * L. PyTorch gate
        #     order (i, f, g, o). Elementwise math kept f32 (v5e constraint).
        h = [jnp.zeros((B, H), f32) for _ in range(L)]
        c = [jnp.zeros((B, H), f32) for _ in range(L)]
        h_bf = [jnp.zeros((B, H), bf16) for _ in range(L)]

        for d in range(S + L - 1):
            # top-down within a diagonal: h_bf[l-1] still holds layer l-1 @ time t
            for l in reversed(range(L)):
                t = d - l
                if t < 0 or t >= S:
                    continue
                if l == 0:
                    g_in = gates_in0[t * B:(t + 1) * B, :]
                else:
                    g_in = jnp.dot(h_bf[l - 1], w_ih[l],
                                   preferred_element_type=f32) + b_l[l]
                gates = g_in + jnp.dot(h_bf[l], w_hh[l],
                                       preferred_element_type=f32)    # (B, 4H) f32
                # full-vreg activation + single select instead of 4 quarter-vreg ops
                act = jnp.where(g_mask, jnp.tanh(gates), jax.nn.sigmoid(gates))
                i_g = act[:, 0 * H:1 * H]
                f_g = act[:, 1 * H:2 * H]
                g_g = act[:, 2 * H:3 * H]
                o_g = act[:, 3 * H:4 * H]
                c[l] = f_g * c[l] + i_g * g_g
                h[l] = o_g * jnp.tanh(c[l])
                h_bf[l] = h[l].astype(bf16)

        # --- dropout(p=0.2): eval mode -> identity
        # --- fc2 on last timestep of the top layer
        fc2_b = bias_ref[1:2, 0:OUT]
        out = jnp.dot(h_bf[L - 1], fc2_w_ref[...],
                      preferred_element_type=f32) + fc2_b
        out_ref[...] = out.astype(out_ref.dtype)

    return kernel


# ------------------------- one-time parameter packing ------------------------
def pack_params(p, *, input_dim, hidden_dim, output_dim, num_layers,
                fc1_dim=64, eps=1e-5):
    """Build packed/bf16 weight arrays ONCE (outside the per-call path)."""
    H, L = hidden_dim, num_layers
    scale = p["bn_gamma"] * jax.lax.rsqrt(p["bn_var"] + eps)
    shift = p["bn_beta"] - p["bn_mean"] * scale
    bn = jnp.concatenate([scale, shift]).reshape(2 * input_dim, 1, 1)

    bw = max(4 * H, fc1_dim, output_dim)

    def row(v):
        return jnp.pad(v, (0, bw - v.shape[0]))[None, :]

    bias = jnp.concatenate(
        [row(p["fc1_b"]), row(p["fc2_b"])] + [row(p[f"b_{l}"]) for l in range(L)],
        axis=0)                                                    # (2+L, bw) f32

    rec_w = jnp.concatenate(
        [p[f"w_hh_{l}"][None] for l in range(L)]
        + [p[f"w_ih_{l}"][None] for l in range(1, L)], axis=0)     # (2L-1, H, 4H)

    return {
        "bn": bn.astype(jnp.float32),
        "fc1_w": p["fc1_w"].astype(jnp.bfloat16),                  # (D, 64)
        "w_ih0": p["w_ih_0"].astype(jnp.bfloat16),                 # (64, 4H)
        "rec_w": rec_w.astype(jnp.bfloat16),
        "fc2_w": p["fc2_w"].astype(jnp.bfloat16),                  # (H, out)
        "bias": bias.astype(jnp.float32),
    }


# ------------------------------- wrapper -------------------------------------
def improved_pt2_lstm_forward(x, packed, *, num_layers, hidden_dim, output_dim):
    B, S, D = x.shape
    # Time-major layout for the kernel (layout plumbing, not compute hoisting).
    x_t = jnp.transpose(x, (1, 0, 2))                              # (S, B, D)

    vmem = pl.BlockSpec(memory_space=pltpu.MemorySpace.VMEM)
    inputs = (x_t, packed["bn"], packed["fc1_w"], packed["w_ih0"],
              packed["rec_w"], packed["fc2_w"], packed["bias"])
    return pl.pallas_call(
        _make_kernel(num_layers, hidden_dim, output_dim, B, S),
        out_shape=jax.ShapeDtypeStruct((B, output_dim), jnp.float32),
        in_specs=[vmem] * len(inputs),
        out_specs=vmem,
    )(*inputs)


# ----------------------------- pure-JAX reference ----------------------------
def reference_forward(x, p, *, num_layers, hidden_dim):
    H = hidden_dim
    B, S, D = x.shape
    inv_std = jax.lax.rsqrt(p["bn_var"][None, :, None] + 1e-5)
    xb = (x - p["bn_mean"][None, :, None]) * inv_std * p["bn_gamma"][None, :, None] \
        + p["bn_beta"][None, :, None]
    xb = jnp.maximum(xb, 0.0)
    h1 = jnp.maximum(jnp.einsum("bsd,df->bsf", xb, p["fc1_w"]) + p["fc1_b"], 0.0)
    seq = h1
    for l in range(num_layers):
        w_ih, w_hh, b = p[f"w_ih_{l}"], p[f"w_hh_{l}"], p[f"b_{l}"]
        h = jnp.zeros((B, H)); c = jnp.zeros((B, H))
        outs = []
        for t in range(S):
            gates = seq[:, t, :] @ w_ih + h @ w_hh + b
            i_g = jax.nn.sigmoid(gates[:, 0 * H:1 * H])
            f_g = jax.nn.sigmoid(gates[:, 1 * H:2 * H])
            g_g = jnp.tanh(gates[:, 2 * H:3 * H])
            o_g = jax.nn.sigmoid(gates[:, 3 * H:4 * H])
            c = f_g * c + i_g * g_g
            h = o_g * jnp.tanh(c)
            outs.append(h)
        seq = jnp.stack(outs, axis=1)
    return seq[:, -1, :] @ p["fc2_w"] + p["fc2_b"]


# ------------------------------- param init ----------------------------------
def init_params(key, input_dim, hidden_dim, output_dim, num_layers):
    H = hidden_dim
    ks = jax.random.split(key, 8 + 3 * num_layers)
    p = {
        "bn_gamma": jax.random.uniform(ks[0], (input_dim,), jnp.float32, 0.5, 1.5),
        "bn_beta": jax.random.normal(ks[1], (input_dim,), jnp.float32) * 0.1,
        "bn_mean": jax.random.normal(ks[2], (input_dim,), jnp.float32) * 0.1,
        "bn_var": jax.random.uniform(ks[3], (input_dim,), jnp.float32, 0.5, 1.5),
        "fc1_w": jax.random.normal(ks[4], (input_dim, 64), jnp.float32) * 0.1,
        "fc1_b": jax.random.normal(ks[5], (64,), jnp.float32) * 0.1,
        "fc2_w": jax.random.normal(ks[6], (H, output_dim), jnp.float32) * 0.1,
        "fc2_b": jax.random.normal(ks[7], (output_dim,), jnp.float32) * 0.1,
    }
    for l in range(num_layers):
        in_dim = 64 if l == 0 else H
        kw = jax.random.split(ks[8 + 3 * l], 3)
        p[f"w_ih_{l}"] = jax.random.normal(kw[0], (in_dim, 4 * H), jnp.float32) * 0.1
        p[f"w_hh_{l}"] = jax.random.normal(kw[1], (H, 4 * H), jnp.float32) * 0.1
        p[f"b_{l}"] = jax.random.normal(kw[2], (4 * H,), jnp.float32) * 0.1  # b_ih + b_hh
    return p


if __name__ == "__main__":
    # nn.BatchNorm1d(input_dim) on (B, S, input_dim) requires S == input_dim.
    # B = 8 (multiple of 8) so gate tiles fill full sublanes.
    B, INPUT_DIM, HIDDEN_DIM, OUTPUT_DIM, NUM_LAYERS = 8, 8, 32, 4, 2
    S = INPUT_DIM

    key = jax.random.PRNGKey(0)
    kx, kp = jax.random.split(key)
    x = jax.random.normal(kx, (B, S, INPUT_DIM), jnp.float32)
    params = init_params(kp, INPUT_DIM, HIDDEN_DIM, OUTPUT_DIM, NUM_LAYERS)

    # Packing happens ONCE (parameter-load time), not per forward call.
    packed = pack_params(params, input_dim=INPUT_DIM, hidden_dim=HIDDEN_DIM,
                         output_dim=OUTPUT_DIM, num_layers=NUM_LAYERS)

    fwd = jax.jit(functools.partial(
        improved_pt2_lstm_forward,
        num_layers=NUM_LAYERS, hidden_dim=HIDDEN_DIM, output_dim=OUTPUT_DIM))
    out = jax.block_until_ready(fwd(x, packed))

    ref = reference_forward(x, params, num_layers=NUM_LAYERS, hidden_dim=HIDDEN_DIM)
    assert out.shape == (B, OUTPUT_DIM)
    # Kernel uses bf16 MXU operands (f32 accumulation); reference is pure f32,
    # hence the slightly relaxed tolerance.
    assert jnp.allclose(out, ref, atol=1e-2, rtol=1e-2), (out, ref)
    print("KERNEL_OK")
</pallas_src>

<mosaic_0001>
module attributes {stable_mosaic.version = 11 : i64} {
  func.func @kernel(%arg0: memref<8x8x8xf32, #tpu.memory_space<vmem>>, %arg1: memref<16x1x1xf32, #tpu.memory_space<vmem>>, %arg2: memref<8x64xbf16, #tpu.memory_space<vmem>>, %arg3: memref<64x128xbf16, #tpu.memory_space<vmem>>, %arg4: memref<3x32x128xbf16, #tpu.memory_space<vmem>>, %arg5: memref<32x4xbf16, #tpu.memory_space<vmem>>, %arg6: memref<4x128xf32, #tpu.memory_space<vmem>>, %arg7: memref<8x4xf32, #tpu.memory_space<vmem>>) attributes {dimension_semantics = [], scalar_prefetch = 0 : i64, scratch_operands = 0 : i64, tpu.core_type = #tpu.core_type<tc>} {
    %c0 = arith.constant 0 : index
    %c0_0 = arith.constant 0 : index
    %c0_1 = arith.constant 0 : index
    %0 = vector.load %arg0[%c0, %c0_0, %c0_1] : memref<8x8x8xf32, #tpu.memory_space<vmem>>, vector<8x8x8xf32>
    %c0_2 = arith.constant 0 : index
    %c0_3 = arith.constant 0 : index
    %c0_4 = arith.constant 0 : index
    %1 = vector.load %arg1[%c0_2, %c0_3, %c0_4] : memref<16x1x1xf32, #tpu.memory_space<vmem>>, vector<16x1x1xf32>
    %2 = vector.extract_strided_slice %1 {offsets = [0, 0, 0], sizes = [8, 1, 1], strides = [1, 1, 1]} : vector<16x1x1xf32> to vector<8x1x1xf32>
    %3 = vector.broadcast %2 : vector<8x1x1xf32> to vector<8x8x8xf32>
    %4 = arith.mulf %0, %3 : vector<8x8x8xf32>
    %5 = vector.extract_strided_slice %1 {offsets = [8, 0, 0], sizes = [8, 1, 1], strides = [1, 1, 1]} : vector<16x1x1xf32> to vector<8x1x1xf32>
    %6 = vector.broadcast %5 : vector<8x1x1xf32> to vector<8x8x8xf32>
    %7 = arith.addf %4, %6 : vector<8x8x8xf32>
    %cst = arith.constant 0.000000e+00 : f32
    %8 = vector.broadcast %cst : f32 to vector<8x8x8xf32>
    %9 = arith.maximumf %7, %8 : vector<8x8x8xf32>
    %c0_5 = arith.constant 0 : index
    %c0_6 = arith.constant 0 : index
    %10 = vector.load %arg6[%c0_5, %c0_6] : memref<4x128xf32, #tpu.memory_space<vmem>>, vector<1x64xf32>
    %11 = vector.shape_cast %9 : vector<8x8x8xf32> to vector<64x8xf32>
    %12 = arith.truncf %11 : vector<64x8xf32> to vector<64x8xbf16>
    %c0_7 = arith.constant 0 : index
    %c0_8 = arith.constant 0 : index
    %13 = vector.load %arg2[%c0_7, %c0_8] : memref<8x64xbf16, #tpu.memory_space<vmem>>, vector<8x64xbf16>
    %cst_9 = arith.constant dense<0.000000e+00> : vector<64x64xf32>
    %14 = tpu.matmul %12, %13, %cst_9 {dimension_numbers = #tpu.dot_dimension_numbers<[1], [0], [0], [1], [0, 0, 1, 1], [], []>} : vector<64x8xbf16>, vector<8x64xbf16>, vector<64x64xf32> -> vector<64x64xf32>
    %15 = vector.broadcast %10 : vector<1x64xf32> to vector<64x64xf32>
    %16 = arith.addf %14, %15 : vector<64x64xf32>
    %cst_10 = arith.constant 0.000000e+00 : f32
    %17 = vector.broadcast %cst_10 : f32 to vector<64x64xf32>
    %18 = arith.maximumf %16, %17 : vector<64x64xf32>
    %c2 = arith.constant 2 : index
    %c0_11 = arith.constant 0 : index
    %19 = vector.load %arg6[%c2, %c0_11] : memref<4x128xf32, #tpu.memory_space<vmem>>, vector<1x128xf32>
    %20 = arith.truncf %18 : vector<64x64xf32> to vector<64x64xbf16>
    %c0_12 = arith.constant 0 : index
    %c0_13 = arith.constant 0 : index
    %21 = vector.load %arg3[%c0_12, %c0_13] : memref<64x128xbf16, #tpu.memory_space<vmem>>, vector<64x128xbf16>
    %cst_14 = arith.constant dense<0.000000e+00> : vector<64x128xf32>
    %22 = tpu.matmul %20, %21, %cst_14 {dimension_numbers = #tpu.dot_dimension_numbers<[1], [0], [0], [1], [0, 0, 1, 1], [], []>} : vector<64x64xbf16>, vector<64x128xbf16>, vector<64x128xf32> -> vector<64x128xf32>
    %23 = vector.broadcast %19 : vector<1x128xf32> to vector<64x128xf32>
    %24 = arith.addf %22, %23 : vector<64x128xf32>
    %c0_15 = arith.constant 0 : index
    %c0_16 = arith.constant 0 : index
    %c0_17 = arith.constant 0 : index
    %25 = vector.load %arg4[%c0_15, %c0_16, %c0_17] : memref<3x32x128xbf16, #tpu.memory_space<vmem>>, vector<1x32x128xbf16>
    %26 = vector.shape_cast %25 : vector<1x32x128xbf16> to vector<32x128xbf16>
    %c1 = arith.constant 1 : index
    %c0_18 = arith.constant 0 : index
    %c0_19 = arith.constant 0 : index
    %27 = vector.load %arg4[%c1, %c0_18, %c0_19] : memref<3x32x128xbf16, #tpu.memory_space<vmem>>, vector<1x32x128xbf16>
    %28 = vector.shape_cast %27 : vector<1x32x128xbf16> to vector<32x128xbf16>
    %c2_20 = arith.constant 2 : index
    %c0_21 = arith.constant 0 : index
    %c0_22 = arith.constant 0 : index
    %29 = vector.load %arg4[%c2_20, %c0_21, %c0_22] : memref<3x32x128xbf16, #tpu.memory_space<vmem>>, vector<1x32x128xbf16>
    %30 = vector.shape_cast %29 : vector<1x32x128xbf16> to vector<32x128xbf16>
    %c3 = arith.constant 3 : index
    %c0_23 = arith.constant 0 : index
    %31 = vector.load %arg6[%c3, %c0_23] : memref<4x128xf32, #tpu.memory_space<vmem>>, vector<1x128xf32>
    %32 = tpu.iota {dimensions = array<i32: 1>} : vector<8x128xi32>
    %c64_i32 = arith.constant 64 : i32
    %33 = vector.broadcast %c64_i32 : i32 to vector<8x128xi32>
    %34 = arith.cmpi sge, %32, %33 : vector<8x128xi32>
    %c96_i32 = arith.constant 96 : i32
    %35 = vector.broadcast %c96_i32 : i32 to vector<8x128xi32>
    %36 = arith.cmpi slt, %32, %35 : vector<8x128xi32>
    %37 = arith.andi %34, %36 : vector<8x128xi1>
    %cst_24 = arith.constant 0.000000e+00 : f32
    %38 = vector.broadcast %cst_24 : f32 to vector<8x32xf32>
    %cst_25 = arith.constant 0.000000e+00 : f32
    %39 = vector.broadcast %cst_25 : f32 to vector<8x32xf32>
    %cst_26 = arith.constant 0.000000e+00 : bf16
    %40 = vector.broadcast %cst_26 : bf16 to vector<8x32xbf16>
    %cst_27 = arith.constant 0.000000e+00 : bf16
    %41 = vector.broadcast %cst_27 : bf16 to vector<8x32xbf16>
    %42 = vector.extract_strided_slice %24 {offsets = [0, 0], sizes = [8, 128], strides = [1, 1]} : vector<64x128xf32> to vector<8x128xf32>
    %cst_28 = arith.constant dense<0.000000e+00> : vector<8x128xf32>
    %43 = tpu.matmul %40, %26, %cst_28 {dimension_numbers = #tpu.dot_dimension_numbers<[1], [0], [0], [1], [0, 0, 1, 1], [], []>} : vector<8x32xbf16>, vector<32x128xbf16>, vector<8x128xf32> -> vector<8x128xf32>
    %44 = arith.addf %42, %43 : vector<8x128xf32>
    %45 = math.tanh %44 : vector<8x128xf32>
    %46 = arith.negf %44 : vector<8x128xf32>
    %47 = math.exp %46 : vector<8x128xf32>
    %cst_29 = arith.constant 1.000000e+00 : f32
    %48 = vector.broadcast %cst_29 : f32 to vector<8x128xf32>
    %49 = arith.addf %48, %47 : vector<8x128xf32>
    %50 = arith.divf %48, %49 : vector<8x128xf32>
    %51 = arith.select %37, %45, %50 : vector<8x128xi1>, vector<8x128xf32>
    %52 = vector.extract_strided_slice %51 {offsets = [0, 0], sizes = [8, 32], strides = [1, 1]} : vector<8x128xf32> to vector<8x32xf32>
    %53 = vector.extract_strided_slice %51 {offsets = [0, 32], sizes = [8, 32], strides = [1, 1]} : vector<8x128xf32> to vector<8x32xf32>
    %54 = vector.extract_strided_slice %51 {offsets = [0, 64], sizes = [8, 32], strides = [1, 1]} : vector<8x128xf32> to vector<8x32xf32>
    %55 = vector.extract_strided_slice %51 {offsets = [0, 96], sizes = [8, 32], strides = [1, 1]} : vector<8x128xf32> to vector<8x32xf32>
    %56 = arith.mulf %53, %38 : vector<8x32xf32>
    %57 = arith.mulf %52, %54 : vector<8x32xf32>
    %58 = arith.addf %56, %57 : vector<8x32xf32>
    %59 = math.tanh %58 : vector<8x32xf32>
    %60 = arith.mulf %55, %59 : vector<8x32xf32>
    %61 = arith.truncf %60 : vector<8x32xf32> to vector<8x32xbf16>
    %cst_30 = arith.constant dense<0.000000e+00> : vector<8x128xf32>
    %62 = tpu.matmul %61, %30, %cst_30 {dimension_numbers = #tpu.dot_dimension_numbers<[1], [0], [0], [1], [0, 0, 1, 1], [], []>} : vector<8x32xbf16>, vector<32x128xbf16>, vector<8x128xf32> -> vector<8x128xf32>
    %63 = vector.broadcast %31 : vector<1x128xf32> to vector<8x128xf32>
    %64 = arith.addf %62, %63 : vector<8x128xf32>
    %cst_31 = arith.constant dense<0.000000e+00> : vector<8x128xf32>
    %65 = tpu.matmul %41, %28, %cst_31 {dimension_numbers = #tpu.dot_dimension_numbers<[1], [0], [0], [1], [0, 0, 1, 1], [], []>} : vector<8x32xbf16>, vector<32x128xbf16>, vector<8x128xf32> -> vector<8x128xf32>
    %66 = arith.addf %64, %65 : vector<8x128xf32>
    %67 = math.tanh %66 : vector<8x128xf32>
    %68 = arith.negf %66 : vector<8x128xf32>
    %69 = math.exp %68 : vector<8x128xf32>
    %cst_32 = arith.constant 1.000000e+00 : f32
    %70 = vector.broadcast %cst_32 : f32 to vector<8x128xf32>
    %71 = arith.addf %70, %69 : vector<8x128xf32>
    %72 = arith.divf %70, %71 : vector<8x128xf32>
    %73 = arith.select %37, %67, %72 : vector<8x128xi1>, vector<8x128xf32>
    %74 = vector.extract_strided_slice %73 {offsets = [0, 0], sizes = [8, 32], strides = [1, 1]} : vector<8x128xf32> to vector<8x32xf32>
    %75 = vector.extract_strided_slice %73 {offsets = [0, 32], sizes = [8, 32], strides = [1, 1]} : vector<8x128xf32> to vector<8x32xf32>
    %76 = vector.extract_strided_slice %73 {offsets = [0, 64], sizes = [8, 32], strides = [1, 1]} : vector<8x128xf32> to vector<8x32xf32>
    %77 = vector.extract_strided_slice %73 {offsets = [0, 96], sizes = [8, 32], strides = [1, 1]} : vector<8x128xf32> to vector<8x32xf32>
    %78 = arith.mulf %75, %39 : vector<8x32xf32>
    %79 = arith.mulf %74, %76 : vector<8x32xf32>
    %80 = arith.addf %78, %79 : vector<8x32xf32>
    %81 = math.tanh %80 : vector<8x32xf32>
    %82 = arith.mulf %77, %81 : vector<8x32xf32>
    %83 = arith.truncf %82 : vector<8x32xf32> to vector<8x32xbf16>
    %84 = vector.extract_strided_slice %24 {offsets = [8, 0], sizes = [8, 128], strides = [1, 1]} : vector<64x128xf32> to vector<8x128xf32>
    %cst_33 = arith.constant dense<0.000000e+00> : vector<8x128xf32>
    %85 = tpu.matmul %61, %26, %cst_33 {dimension_numbers = #tpu.dot_dimension_numbers<[1], [0], [0], [1], [0, 0, 1, 1], [], []>} : vector<8x32xbf16>, vector<32x128xbf16>, vector<8x128xf32> -> vector<8x128xf32>
    %86 = arith.addf %84, %85 : vector<8x128xf32>
    %87 = math.tanh %86 : vector<8x128xf32>
    %88 = arith.negf %86 : vector<8x128xf32>
    %89 = math.exp %88 : vector<8x128xf32>
    %cst_34 = arith.constant 1.000000e+00 : f32
    %90 = vector.broadcast %cst_34 : f32 to vector<8x128xf32>
    %91 = arith.addf %90, %89 : vector<8x128xf32>
    %92 = arith.divf %90, %91 : vector<8x128xf32>
    %93 = arith.select %37, %87, %92 : vector<8x128xi1>, vector<8x128xf32>
    %94 = vector.extract_strided_slice %93 {offsets = [0, 0], sizes = [8, 32], strides = [1, 1]} : vector<8x128xf32> to vector<8x32xf32>
    %95 = vector.extract_strided_slice %93 {offsets = [0, 32], sizes = [8, 32], strides = [1, 1]} : vector<8x128xf32> to vector<8x32xf32>
    %96 = vector.extract_strided_slice %93 {offsets = [0, 64], sizes = [8, 32], strides = [1, 1]} : vector<8x128xf32> to vector<8x32xf32>
    %97 = vector.extract_strided_slice %93 {offsets = [0, 96], sizes = [8, 32], strides = [1, 1]} : vector<8x128xf32> to vector<8x32xf32>
    %98 = arith.mulf %95, %58 : vector<8x32xf32>
    %99 = arith.mulf %94, %96 : vector<8x32xf32>
    %100 = arith.addf %98, %99 : vector<8x32xf32>
    %101 = math.tanh %100 : vector<8x32xf32>
    %102 = arith.mulf %97, %101 : vector<8x32xf32>
    %103 = arith.truncf %102 : vector<8x32xf32> to vector<8x32xbf16>
    %cst_35 = arith.constant dense<0.000000e+00> : vector<8x128xf32>
    %104 = tpu.matmul %103, %30, %cst_35 {dimension_numbers = #tpu.dot_dimension_numbers<[1], [0], [0], [1], [0, 0, 1, 1], [], []>} : vector<8x32xbf16>, vector<32x128xbf16>, vector<8x128xf32> -> vector<8x128xf32>
    %105 = vector.broadcast %31 : vector<1x128xf32> to vector<8x128xf32>
    %106 = arith.addf %104, %105 : vector<8x128xf32>
    %cst_36 = arith.constant dense<0.000000e+00> : vector<8x128xf32>
    %107 = tpu.matmul %83, %28, %cst_36 {dimension_numbers = #tpu.dot_dimension_numbers<[1], [0], [0], [1], [0, 0, 1, 1], [], []>} : vector<8x32xbf16>, vector<32x128xbf16>, vector<8x128xf32> -> vector<8x128xf32>
    %108 = arith.addf %106, %107 : vector<8x128xf32>
    %109 = math.tanh %108 : vector<8x128xf32>
    %110 = arith.negf %108 : vector<8x128xf32>
    %111 = math.exp %110 : vector<8x128xf32>
    %cst_37 = arith.constant 1.000000e+00 : f32
    %112 = vector.broadcast %cst_37 : f32 to vector<8x128xf32>
    %113 = arith.addf %112, %111 : vector<8x128xf32>
    %114 = arith.divf %112, %113 : vector<8x128xf32>
    %115 = arith.select %37, %109, %114 : vector<8x128xi1>, vector<8x128xf32>
    %116 = vector.extract_strided_slice %115 {offsets = [0, 0], sizes = [8, 32], strides = [1, 1]} : vector<8x128xf32> to vector<8x32xf32>
    %117 = vector.extract_strided_slice %115 {offsets = [0, 32], sizes = [8, 32], strides = [1, 1]} : vector<8x128xf32> to vector<8x32xf32>
    %118 = vector.extract_strided_slice %115 {offsets = [0, 64], sizes = [8, 32], strides = [1, 1]} : vector<8x128xf32> to vector<8x32xf32>
    %119 = vector.extract_strided_slice %115 {offsets = [0, 96], sizes = [8, 32], strides = [1, 1]} : vector<8x128xf32> to vector<8x32xf32>
    %120 = arith.mulf %117, %80 : vector<8x32xf32>
    %121 = arith.mulf %116, %118 : vector<8x32xf32>
    %122 = arith.addf %120, %121 : vector<8x32xf32>
    %123 = math.tanh %122 : vector<8x32xf32>
    %124 = arith.mulf %119, %123 : vector<8x32xf32>
    %125 = arith.truncf %124 : vector<8x32xf32> to vector<8x32xbf16>
    %126 = vector.extract_strided_slice %24 {offsets = [16, 0], sizes = [8, 128], strides = [1, 1]} : vector<64x128xf32> to vector<8x128xf32>
    %cst_38 = arith.constant dense<0.000000e+00> : vector<8x128xf32>
    %127 = tpu.matmul %103, %26, %cst_38 {dimension_numbers = #tpu.dot_dimension_numbers<[1], [0], [0], [1], [0, 0, 1, 1], [], []>} : vector<8x32xbf16>, vector<32x128xbf16>, vector<8x128xf32> -> vector<8x128xf32>
    %128 = arith.addf %126, %127 : vector<8x128xf32>
    %129 = math.tanh %128 : vector<8x128xf32>
    %130 = arith.negf %128 : vector<8x128xf32>
    %131 = math.exp %130 : vector<8x128xf32>
    %cst_39 = arith.constant 1.000000e+00 : f32
    %132 = vector.broadcast %cst_39 : f32 to vector<8x128xf32>
    %133 = arith.addf %132, %131 : vector<8x128xf32>
    %134 = arith.divf %132, %133 : vector<8x128xf32>
    %135 = arith.select %37, %129, %134 : vector<8x128xi1>, vector<8x128xf32>
    %136 = vector.extract_strided_slice %135 {offsets = [0, 0], sizes = [8, 32], strides = [1, 1]} : vector<8x128xf32> to vector<8x32xf32>
    %137 = vector.extract_strided_slice %135 {offsets = [0, 32], sizes = [8, 32], strides = [1, 1]} : vector<8x128xf32> to vector<8x32xf32>
    %138 = vector.extract_strided_slice %135 {offsets = [0, 64], sizes = [8, 32], strides = [1, 1]} : vector<8x128xf32> to vector<8x32xf32>
    %139 = vector.extract_strided_slice %135 {offsets = [0, 96], sizes = [8, 32], strides = [1, 1]} : vector<8x128xf32> to vector<8x32xf32>
    %140 = arith.mulf %137, %100 : vector<8x32xf32>
    %141 = arith.mulf %136, %138 : vector<8x32xf32>
    %142 = arith.addf %140, %141 : vector<8x32xf32>
    %143 = math.tanh %142 : vector<8x32xf32>
    %144 = arith.mulf %139, %143 : vector<8x32xf32>
    %145 = arith.truncf %144 : vector<8x32xf32> to vector<8x32xbf16>
    %cst_40 = arith.constant dense<0.000000e+00> : vector<8x128xf32>
    %146 = tpu.matmul %145, %30, %cst_40 {dimension_numbers = #tpu.dot_dimension_numbers<[1], [0], [0], [1], [0, 0, 1, 1], [], []>} : vector<8x32xbf16>, vector<32x128xbf16>, vector<8x128xf32> -> vector<8x128xf32>
    %147 = vector.broadcast %31 : vector<1x128xf32> to vector<8x128xf32>
    %148 = arith.addf %146, %147 : vector<8x128xf32>
    %cst_41 = arith.constant dense<0.000000e+00> : vector<8x128xf32>
    %149 = tpu.matmul %125, %28, %cst_41 {dimension_numbers = #tpu.dot_dimension_numbers<[1], [0], [0], [1], [0, 0, 1, 1], [], []>} : vector<8x32xbf16>, vector<32x128xbf16>, vector<8x128xf32> -> vector<8x128xf32>
    %150 = arith.addf %148, %149 : vector<8x128xf32>
    %151 = math.tanh %150 : vector<8x128xf32>
    %152 = arith.negf %150 : vector<8x128xf32>
    %153 = math.exp %152 : vector<8x128xf32>
    %cst_42 = arith.constant 1.000000e+00 : f32
    %154 = vector.broadcast %cst_42 : f32 to vector<8x128xf32>
    %155 = arith.addf %154, %153 : vector<8x128xf32>
    %156 = arith.divf %154, %155 : vector<8x128xf32>
    %157 = arith.select %37, %151, %156 : vector<8x128xi1>, vector<8x128xf32>
    %158 = vector.extract_strided_slice %157 {offsets = [0, 0], sizes = [8, 32], strides = [1, 1]} : vector<8x128xf32> to vector<8x32xf32>
    %159 = vector.extract_strided_slice %157 {offsets = [0, 32], sizes = [8, 32], strides = [1, 1]} : vector<8x128xf32> to vector<8x32xf32>
    %160 = vector.extract_strided_slice %157 {offsets = [0, 64], sizes = [8, 32], strides = [1, 1]} : vector<8x128xf32> to vector<8x32xf32>
    %161 = vector.extract_strided_slice %157 {offsets = [0, 96], sizes = [8, 32], strides = [1, 1]} : vector<8x128xf32> to vector<8x32xf32>
    %162 = arith.mulf %159, %122 : vector<8x32xf32>
    %163 = arith.mulf %158, %160 : vector<8x32xf32>
    %164 = arith.addf %162, %163 : vector<8x32xf32>
    %165 = math.tanh %164 : vector<8x32xf32>
    %166 = arith.mulf %161, %165 : vector<8x32xf32>
    %167 = arith.truncf %166 : vector<8x32xf32> to vector<8x32xbf16>
    %168 = vector.extract_strided_slice %24 {offsets = [24, 0], sizes = [8, 128], strides = [1, 1]} : vector<64x128xf32> to vector<8x128xf32>
    %cst_43 = arith.constant dense<0.000000e+00> : vector<8x128xf32>
    %169 = tpu.matmul %145, %26, %cst_43 {dimension_numbers = #tpu.dot_dimension_numbers<[1], [0], [0], [1], [0, 0, 1, 1], [], []>} : vector<8x32xbf16>, vector<32x128xbf16>, vector<8x128xf32> -> vector<8x128xf32>
    %170 = arith.addf %168, %169 : vector<8x128xf32>
    %171 = math.tanh %170 : vector<8x128xf32>
    %172 = arith.negf %170 : vector<8x128xf32>
    %173 = math.exp %172 : vector<8x128xf32>
    %cst_44 = arith.constant 1.000000e+00 : f32
    %174 = vector.broadcast %cst_44 : f32 to vector<8x128xf32>
    %175 = arith.addf %174, %173 : vector<8x128xf32>
    %176 = arith.divf %174, %175 : vector<8x128xf32>
    %177 = arith.select %37, %171, %176 : vector<8x128xi1>, vector<8x128xf32>
    %178 = vector.extract_strided_slice %177 {offsets = [0, 0], sizes = [8, 32], strides = [1, 1]} : vector<8x128xf32> to vector<8x32xf32>
    %179 = vector.extract_strided_slice %177 {offsets = [0, 32], sizes = [8, 32], strides = [1, 1]} : vector<8x128xf32> to vector<8x32xf32>
    %180 = vector.extract_strided_slice %177 {offsets = [0, 64], sizes = [8, 32], strides = [1, 1]} : vector<8x128xf32> to vector<8x32xf32>
    %181 = vector.extract_strided_slice %177 {offsets = [0, 96], sizes = [8, 32], strides = [1, 1]} : vector<8x128xf32> to vector<8x32xf32>
    %182 = arith.mulf %179, %142 : vector<8x32xf32>
    %183 = arith.mulf %178, %180 : vector<8x32xf32>
    %184 = arith.addf %182, %183 : vector<8x32xf32>
    %185 = math.tanh %184 : vector<8x32xf32>
    %186 = arith.mulf %181, %185 : vector<8x32xf32>
    %187 = arith.truncf %186 : vector<8x32xf32> to vector<8x32xbf16>
    %cst_45 = arith.constant dense<0.000000e+00> : vector<8x128xf32>
    %188 = tpu.matmul %187, %30, %cst_45 {dimension_numbers = #tpu.dot_dimension_numbers<[1], [0], [0], [1], [0, 0, 1, 1], [], []>} : vector<8x32xbf16>, vector<32x128xbf16>, vector<8x128xf32> -> vector<8x128xf32>
    %189 = vector.broadcast %31 : vector<1x128xf32> to vector<8x128xf32>
    %190 = arith.addf %188, %189 : vector<8x128xf32>
    %cst_46 = arith.constant dense<0.000000e+00> : vector<8x128xf32>
    %191 = tpu.matmul %167, %28, %cst_46 {dimension_numbers = #tpu.dot_dimension_numbers<[1], [0], [0], [1], [0, 0, 1, 1], [], []>} : vector<8x32xbf16>, vector<32x128xbf16>, vector<8x128xf32> -> vector<8x128xf32>
    %192 = arith.addf %190, %191 : vector<8x128xf32>
    %193 = math.tanh %192 : vector<8x128xf32>
    %194 = arith.negf %192 : vector<8x128xf32>
    %195 = math.exp %194 : vector<8x128xf32>
    %cst_47 = arith.constant 1.000000e+00 : f32
    %196 = vector.broadcast %cst_47 : f32 to vector<8x128xf32>
    %197 = arith.addf %196, %195 : vector<8x128xf32>
    %198 = arith.divf %196, %197 : vector<8x128xf32>
    %199 = arith.select %37, %193, %198 : vector<8x128xi1>, vector<8x128xf32>
    %200 = vector.extract_strided_slice %199 {offsets = [0, 0], sizes = [8, 32], strides = [1, 1]} : vector<8x128xf32> to vector<8x32xf32>
    %201 = vector.extract_strided_slice %199 {offsets = [0, 32], sizes = [8, 32], strides = [1, 1]} : vector<8x128xf32> to vector<8x32xf32>
    %202 = vector.extract_strided_slice %199 {offsets = [0, 64], sizes = [8, 32], strides = [1, 1]} : vector<8x128xf32> to vector<8x32xf32>
    %203 = vector.extract_strided_slice %199 {offsets = [0, 96], sizes = [8, 32], strides = [1, 1]} : vector<8x128xf32> to vector<8x32xf32>
    %204 = arith.mulf %201, %164 : vector<8x32xf32>
    %205 = arith.mulf %200, %202 : vector<8x32xf32>
    %206 = arith.addf %204, %205 : vector<8x32xf32>
    %207 = math.tanh %206 : vector<8x32xf32>
    %208 = arith.mulf %203, %207 : vector<8x32xf32>
    %209 = arith.truncf %208 : vector<8x32xf32> to vector<8x32xbf16>
    %210 = vector.extract_strided_slice %24 {offsets = [32, 0], sizes = [8, 128], strides = [1, 1]} : vector<64x128xf32> to vector<8x128xf32>
    %cst_48 = arith.constant dense<0.000000e+00> : vector<8x128xf32>
    %211 = tpu.matmul %187, %26, %cst_48 {dimension_numbers = #tpu.dot_dimension_numbers<[1], [0], [0], [1], [0, 0, 1, 1], [], []>} : vector<8x32xbf16>, vector<32x128xbf16>, vector<8x128xf32> -> vector<8x128xf32>
    %212 = arith.addf %210, %211 : vector<8x128xf32>
    %213 = math.tanh %212 : vector<8x128xf32>
    %214 = arith.negf %212 : vector<8x128xf32>
    %215 = math.exp %214 : vector<8x128xf32>
    %cst_49 = arith.constant 1.000000e+00 : f32
    %216 = vector.broadcast %cst_49 : f32 to vector<8x128xf32>
    %217 = arith.addf %216, %215 : vector<8x128xf32>
    %218 = arith.divf %216, %217 : vector<8x128xf32>
    %219 = arith.select %37, %213, %218 : vector<8x128xi1>, vector<8x128xf32>
    %220 = vector.extract_strided_slice %219 {offsets = [0, 0], sizes = [8, 32], strides = [1, 1]} : vector<8x128xf32> to vector<8x32xf32>
    %221 = vector.extract_strided_slice %219 {offsets = [0, 32], sizes = [8, 32], strides = [1, 1]} : vector<8x128xf32> to vector<8x32xf32>
    %222 = vector.extract_strided_slice %219 {offsets = [0, 64], sizes = [8, 32], strides = [1, 1]} : vector<8x128xf32> to vector<8x32xf32>
    %223 = vector.extract_strided_slice %219 {offsets = [0, 96], sizes = [8, 32], strides = [1, 1]} : vector<8x128xf32> to vector<8x32xf32>
    %224 = arith.mulf %221, %184 : vector<8x32xf32>
    %225 = arith.mulf %220, %222 : vector<8x32xf32>
    %226 = arith.addf %224, %225 : vector<8x32xf32>
    %227 = math.tanh %226 : vector<8x32xf32>
    %228 = arith.mulf %223, %227 : vector<8x32xf32>
    %229 = arith.truncf %228 : vector<8x32xf32> to vector<8x32xbf16>
    %cst_50 = arith.constant dense<0.000000e+00> : vector<8x128xf32>
    %230 = tpu.matmul %229, %30, %cst_50 {dimension_numbers = #tpu.dot_dimension_numbers<[1], [0], [0], [1], [0, 0, 1, 1], [], []>} : vector<8x32xbf16>, vector<32x128xbf16>, vector<8x128xf32> -> vector<8x128xf32>
    %231 = vector.broadcast %31 : vector<1x128xf32> to vector<8x128xf32>
    %232 = arith.addf %230, %231 : vector<8x128xf32>
    %cst_51 = arith.constant dense<0.000000e+00> : vector<8x128xf32>
    %233 = tpu.matmul %209, %28, %cst_51 {dimension_numbers = #tpu.dot_dimension_numbers<[1], [0], [0], [1], [0, 0, 1, 1], [], []>} : vector<8x32xbf16>, vector<32x128xbf16>, vector<8x128xf32> -> vector<8x128xf32>
    %234 = arith.addf %232, %233 : vector<8x128xf32>
    %235 = math.tanh %234 : vector<8x128xf32>
    %236 = arith.negf %234 : vector<8x128xf32>
    %237 = math.exp %236 : vector<8x128xf32>
    %cst_52 = arith.constant 1.000000e+00 : f32
    %238 = vector.broadcast %cst_52 : f32 to vector<8x128xf32>
    %239 = arith.addf %238, %237 : vector<8x128xf32>
    %240 = arith.divf %238, %239 : vector<8x128xf32>
    %241 = arith.select %37, %235, %240 : vector<8x128xi1>, vector<8x128xf32>
    %242 = vector.extract_strided_slice %241 {offsets = [0, 0], sizes = [8, 32], strides = [1, 1]} : vector<8x128xf32> to vector<8x32xf32>
    %243 = vector.extract_strided_slice %241 {offsets = [0, 32], sizes = [8, 32], strides = [1, 1]} : vector<8x128xf32> to vector<8x32xf32>
    %244 = vector.extract_strided_slice %241 {offsets = [0, 64], sizes = [8, 32], strides = [1, 1]} : vector<8x128xf32> to vector<8x32xf32>
    %245 = vector.extract_strided_slice %241 {offsets = [0, 96], sizes = [8, 32], strides = [1, 1]} : vector<8x128xf32> to vector<8x32xf32>
    %246 = arith.mulf %243, %206 : vector<8x32xf32>
    %247 = arith.mulf %242, %244 : vector<8x32xf32>
    %248 = arith.addf %246, %247 : vector<8x32xf32>
    %249 = math.tanh %248 : vector<8x32xf32>
    %250 = arith.mulf %245, %249 : vector<8x32xf32>
    %251 = arith.truncf %250 : vector<8x32xf32> to vector<8x32xbf16>
    %252 = vector.extract_strided_slice %24 {offsets = [40, 0], sizes = [8, 128], strides = [1, 1]} : vector<64x128xf32> to vector<8x128xf32>
    %cst_53 = arith.constant dense<0.000000e+00> : vector<8x128xf32>
    %253 = tpu.matmul %229, %26, %cst_53 {dimension_numbers = #tpu.dot_dimension_numbers<[1], [0], [0], [1], [0, 0, 1, 1], [], []>} : vector<8x32xbf16>, vector<32x128xbf16>, vector<8x128xf32> -> vector<8x128xf32>
    %254 = arith.addf %252, %253 : vector<8x128xf32>
    %255 = math.tanh %254 : vector<8x128xf32>
    %256 = arith.negf %254 : vector<8x128xf32>
    %257 = math.exp %256 : vector<8x128xf32>
    %cst_54 = arith.constant 1.000000e+00 : f32
    %258 = vector.broadcast %cst_54 : f32 to vector<8x128xf32>
    %259 = arith.addf %258, %257 : vector<8x128xf32>
    %260 = arith.divf %258, %259 : vector<8x128xf32>
    %261 = arith.select %37, %255, %260 : vector<8x128xi1>, vector<8x128xf32>
    %262 = vector.extract_strided_slice %261 {offsets = [0, 0], sizes = [8, 32], strides = [1, 1]} : vector<8x128xf32> to vector<8x32xf32>
    %263 = vector.extract_strided_slice %261 {offsets = [0, 32], sizes = [8, 32], strides = [1, 1]} : vector<8x128xf32> to vector<8x32xf32>
    %264 = vector.extract_strided_slice %261 {offsets = [0, 64], sizes = [8, 32], strides = [1, 1]} : vector<8x128xf32> to vector<8x32xf32>
    %265 = vector.extract_strided_slice %261 {offsets = [0, 96], sizes = [8, 32], strides = [1, 1]} : vector<8x128xf32> to vector<8x32xf32>
    %266 = arith.mulf %263, %226 : vector<8x32xf32>
    %267 = arith.mulf %262, %264 : vector<8x32xf32>
    %268 = arith.addf %266, %267 : vector<8x32xf32>
    %269 = math.tanh %268 : vector<8x32xf32>
    %270 = arith.mulf %265, %269 : vector<8x32xf32>
    %271 = arith.truncf %270 : vector<8x32xf32> to vector<8x32xbf16>
    %cst_55 = arith.constant dense<0.000000e+00> : vector<8x128xf32>
    %272 = tpu.matmul %271, %30, %cst_55 {dimension_numbers = #tpu.dot_dimension_numbers<[1], [0], [0], [1], [0, 0, 1, 1], [], []>} : vector<8x32xbf16>, vector<32x128xbf16>, vector<8x128xf32> -> vector<8x128xf32>
    %273 = vector.broadcast %31 : vector<1x128xf32> to vector<8x128xf32>
    %274 = arith.addf %272, %273 : vector<8x128xf32>
    %cst_56 = arith.constant dense<0.000000e+00> : vector<8x128xf32>
    %275 = tpu.matmul %251, %28, %cst_56 {dimension_numbers = #tpu.dot_dimension_numbers<[1], [0], [0], [1], [0, 0, 1, 1], [], []>} : vector<8x32xbf16>, vector<32x128xbf16>, vector<8x128xf32> -> vector<8x128xf32>
    %276 = arith.addf %274, %275 : vector<8x128xf32>
    %277 = math.tanh %276 : vector<8x128xf32>
    %278 = arith.negf %276 : vector<8x128xf32>
    %279 = math.exp %278 : vector<8x128xf32>
    %cst_57 = arith.constant 1.000000e+00 : f32
    %280 = vector.broadcast %cst_57 : f32 to vector<8x128xf32>
    %281 = arith.addf %280, %279 : vector<8x128xf32>
    %282 = arith.divf %280, %281 : vector<8x128xf32>
    %283 = arith.select %37, %277, %282 : vector<8x128xi1>, vector<8x128xf32>
    %284 = vector.extract_strided_slice %283 {offsets = [0, 0], sizes = [8, 32], strides = [1, 1]} : vector<8x128xf32> to vector<8x32xf32>
    %285 = vector.extract_strided_slice %283 {offsets = [0, 32], sizes = [8, 32], strides = [1, 1]} : vector<8x128xf32> to vector<8x32xf32>
    %286 = vector.extract_strided_slice %283 {offsets = [0, 64], sizes = [8, 32], strides = [1, 1]} : vector<8x128xf32> to vector<8x32xf32>
    %287 = vector.extract_strided_slice %283 {offsets = [0, 96], sizes = [8, 32], strides = [1, 1]} : vector<8x128xf32> to vector<8x32xf32>
    %288 = arith.mulf %285, %248 : vector<8x32xf32>
    %289 = arith.mulf %284, %286 : vector<8x32xf32>
    %290 = arith.addf %288, %289 : vector<8x32xf32>
    %291 = math.tanh %290 : vector<8x32xf32>
    %292 = arith.mulf %287, %291 : vector<8x32xf32>
    %293 = arith.truncf %292 : vector<8x32xf32> to vector<8x32xbf16>
    %294 = vector.extract_strided_slice %24 {offsets = [48, 0], sizes = [8, 128], strides = [1, 1]} : vector<64x128xf32> to vector<8x128xf32>
    %cst_58 = arith.constant dense<0.000000e+00> : vector<8x128xf32>
    %295 = tpu.matmul %271, %26, %cst_58 {dimension_numbers = #tpu.dot_dimension_numbers<[1], [0], [0], [1], [0, 0, 1, 1], [], []>} : vector<8x32xbf16>, vector<32x128xbf16>, vector<8x128xf32> -> vector<8x128xf32>
    %296 = arith.addf %294, %295 : vector<8x128xf32>
    %297 = math.tanh %296 : vector<8x128xf32>
    %298 = arith.negf %296 : vector<8x128xf32>
    %299 = math.exp %298 : vector<8x128xf32>
    %cst_59 = arith.constant 1.000000e+00 : f32
    %300 = vector.broadcast %cst_59 : f32 to vector<8x128xf32>
    %301 = arith.addf %300, %299 : vector<8x128xf32>
    %302 = arith.divf %300, %301 : vector<8x128xf32>
    %303 = arith.select %37, %297, %302 : vector<8x128xi1>, vector<8x128xf32>
    %304 = vector.extract_strided_slice %303 {offsets = [0, 0], sizes = [8, 32], strides = [1, 1]} : vector<8x128xf32> to vector<8x32xf32>
    %305 = vector.extract_strided_slice %303 {offsets = [0, 32], sizes = [8, 32], strides = [1, 1]} : vector<8x128xf32> to vector<8x32xf32>
    %306 = vector.extract_strided_slice %303 {offsets = [0, 64], sizes = [8, 32], strides = [1, 1]} : vector<8x128xf32> to vector<8x32xf32>
    %307 = vector.extract_strided_slice %303 {offsets = [0, 96], sizes = [8, 32], strides = [1, 1]} : vector<8x128xf32> to vector<8x32xf32>
    %308 = arith.mulf %305, %268 : vector<8x32xf32>
    %309 = arith.mulf %304, %306 : vector<8x32xf32>
    %310 = arith.addf %308, %309 : vector<8x32xf32>
    %311 = math.tanh %310 : vector<8x32xf32>
    %312 = arith.mulf %307, %311 : vector<8x32xf32>
    %313 = arith.truncf %312 : vector<8x32xf32> to vector<8x32xbf16>
    %cst_60 = arith.constant dense<0.000000e+00> : vector<8x128xf32>
    %314 = tpu.matmul %313, %30, %cst_60 {dimension_numbers = #tpu.dot_dimension_numbers<[1], [0], [0], [1], [0, 0, 1, 1], [], []>} : vector<8x32xbf16>, vector<32x128xbf16>, vector<8x128xf32> -> vector<8x128xf32>
    %315 = vector.broadcast %31 : vector<1x128xf32> to vector<8x128xf32>
    %316 = arith.addf %314, %315 : vector<8x128xf32>
    %cst_61 = arith.constant dense<0.000000e+00> : vector<8x128xf32>
    %317 = tpu.matmul %293, %28, %cst_61 {dimension_numbers = #tpu.dot_dimension_numbers<[1], [0], [0], [1], [0, 0, 1, 1], [], []>} : vector<8x32xbf16>, vector<32x128xbf16>, vector<8x128xf32> -> vector<8x128xf32>
    %318 = arith.addf %316, %317 : vector<8x128xf32>
    %319 = math.tanh %318 : vector<8x128xf32>
    %320 = arith.negf %318 : vector<8x128xf32>
    %321 = math.exp %320 : vector<8x128xf32>
    %cst_62 = arith.constant 1.000000e+00 : f32
    %322 = vector.broadcast %cst_62 : f32 to vector<8x128xf32>
    %323 = arith.addf %322, %321 : vector<8x128xf32>
    %324 = arith.divf %322, %323 : vector<8x128xf32>
    %325 = arith.select %37, %319, %324 : vector<8x128xi1>, vector<8x128xf32>
    %326 = vector.extract_strided_slice %325 {offsets = [0, 0], sizes = [8, 32], strides = [1, 1]} : vector<8x128xf32> to vector<8x32xf32>
    %327 = vector.extract_strided_slice %325 {offsets = [0, 32], sizes = [8, 32], strides = [1, 1]} : vector<8x128xf32> to vector<8x32xf32>
    %328 = vector.extract_strided_slice %325 {offsets = [0, 64], sizes = [8, 32], strides = [1, 1]} : vector<8x128xf32> to vector<8x32xf32>
    %329 = vector.extract_strided_slice %325 {offsets = [0, 96], sizes = [8, 32], strides = [1, 1]} : vector<8x128xf32> to vector<8x32xf32>
    %330 = arith.mulf %327, %290 : vector<8x32xf32>
    %331 = arith.mulf %326, %328 : vector<8x32xf32>
    %332 = arith.addf %330, %331 : vector<8x32xf32>
    %333 = math.tanh %332 : vector<8x32xf32>
    %334 = arith.mulf %329, %333 : vector<8x32xf32>
    %335 = arith.truncf %334 : vector<8x32xf32> to vector<8x32xbf16>
    %336 = vector.extract_strided_slice %24 {offsets = [56, 0], sizes = [8, 128], strides = [1, 1]} : vector<64x128xf32> to vector<8x128xf32>
    %cst_63 = arith.constant dense<0.000000e+00> : vector<8x128xf32>
    %337 = tpu.matmul %313, %26, %cst_63 {dimension_numbers = #tpu.dot_dimension_numbers<[1], [0], [0], [1], [0, 0, 1, 1], [], []>} : vector<8x32xbf16>, vector<32x128xbf16>, vector<8x128xf32> -> vector<8x128xf32>
    %338 = arith.addf %336, %337 : vector<8x128xf32>
    %339 = math.tanh %338 : vector<8x128xf32>
    %340 = arith.negf %338 : vector<8x128xf32>
    %341 = math.exp %340 : vector<8x128xf32>
    %cst_64 = arith.constant 1.000000e+00 : f32
    %342 = vector.broadcast %cst_64 : f32 to vector<8x128xf32>
    %343 = arith.addf %342, %341 : vector<8x128xf32>
    %344 = arith.divf %342, %343 : vector<8x128xf32>
    %345 = arith.select %37, %339, %344 : vector<8x128xi1>, vector<8x128xf32>
    %346 = vector.extract_strided_slice %345 {offsets = [0, 0], sizes = [8, 32], strides = [1, 1]} : vector<8x128xf32> to vector<8x32xf32>
    %347 = vector.extract_strided_slice %345 {offsets = [0, 32], sizes = [8, 32], strides = [1, 1]} : vector<8x128xf32> to vector<8x32xf32>
    %348 = vector.extract_strided_slice %345 {offsets = [0, 64], sizes = [8, 32], strides = [1, 1]} : vector<8x128xf32> to vector<8x32xf32>
    %349 = vector.extract_strided_slice %345 {offsets = [0, 96], sizes = [8, 32], strides = [1, 1]} : vector<8x128xf32> to vector<8x32xf32>
    %350 = arith.mulf %347, %310 : vector<8x32xf32>
    %351 = arith.mulf %346, %348 : vector<8x32xf32>
    %352 = arith.addf %350, %351 : vector<8x32xf32>
    %353 = math.tanh %352 : vector<8x32xf32>
    %354 = arith.mulf %349, %353 : vector<8x32xf32>
    %355 = arith.truncf %354 : vector<8x32xf32> to vector<8x32xbf16>
    %cst_65 = arith.constant dense<0.000000e+00> : vector<8x128xf32>
    %356 = tpu.matmul %355, %30, %cst_65 {dimension_numbers = #tpu.dot_dimension_numbers<[1], [0], [0], [1], [0, 0, 1, 1], [], []>} : vector<8x32xbf16>, vector<32x128xbf16>, vector<8x128xf32> -> vector<8x128xf32>
    %357 = vector.broadcast %31 : vector<1x128xf32> to vector<8x128xf32>
    %358 = arith.addf %356, %357 : vector<8x128xf32>
    %cst_66 = arith.constant dense<0.000000e+00> : vector<8x128xf32>
    %359 = tpu.matmul %335, %28, %cst_66 {dimension_numbers = #tpu.dot_dimension_numbers<[1], [0], [0], [1], [0, 0, 1, 1], [], []>} : vector<8x32xbf16>, vector<32x128xbf16>, vector<8x128xf32> -> vector<8x128xf32>
    %360 = arith.addf %358, %359 : vector<8x128xf32>
    %361 = math.tanh %360 : vector<8x128xf32>
    %362 = arith.negf %360 : vector<8x128xf32>
    %363 = math.exp %362 : vector<8x128xf32>
    %cst_67 = arith.constant 1.000000e+00 : f32
    %364 = vector.broadcast %cst_67 : f32 to vector<8x128xf32>
    %365 = arith.addf %364, %363 : vector<8x128xf32>
    %366 = arith.divf %364, %365 : vector<8x128xf32>
    %367 = arith.select %37, %361, %366 : vector<8x128xi1>, vector<8x128xf32>
    %368 = vector.extract_strided_slice %367 {offsets = [0, 0], sizes = [8, 32], strides = [1, 1]} : vector<8x128xf32> to vector<8x32xf32>
    %369 = vector.extract_strided_slice %367 {offsets = [0, 32], sizes = [8, 32], strides = [1, 1]} : vector<8x128xf32> to vector<8x32xf32>
    %370 = vector.extract_strided_slice %367 {offsets = [0, 64], sizes = [8, 32], strides = [1, 1]} : vector<8x128xf32> to vector<8x32xf32>
    %371 = vector.extract_strided_slice %367 {offsets = [0, 96], sizes = [8, 32], strides = [1, 1]} : vector<8x128xf32> to vector<8x32xf32>
    %372 = arith.mulf %369, %332 : vector<8x32xf32>
    %373 = arith.mulf %368, %370 : vector<8x32xf32>
    %374 = arith.addf %372, %373 : vector<8x32xf32>
    %375 = math.tanh %374 : vector<8x32xf32>
    %376 = arith.mulf %371, %375 : vector<8x32xf32>
    %377 = arith.truncf %376 : vector<8x32xf32> to vector<8x32xbf16>
    %c1_68 = arith.constant 1 : index
    %c0_69 = arith.constant 0 : index
    %378 = vector.load %arg6[%c1_68, %c0_69] : memref<4x128xf32, #tpu.memory_space<vmem>>, vector<1x4xf32>
    %c0_70 = arith.constant 0 : index
    %c0_71 = arith.constant 0 : index
    %379 = vector.load %arg5[%c0_70, %c0_71] : memref<32x4xbf16, #tpu.memory_space<vmem>>, vector<32x4xbf16>
    %cst_72 = arith.constant dense<0.000000e+00> : vector<8x4xf32>
    %380 = tpu.matmul %377, %379, %cst_72 {dimension_numbers = #tpu.dot_dimension_numbers<[1], [0], [0], [1], [0, 0, 1, 1], [], []>} : vector<8x32xbf16>, vector<32x4xbf16>, vector<8x4xf32> -> vector<8x4xf32>
    %381 = vector.broadcast %378 : vector<1x4xf32> to vector<8x4xf32>
    %382 = arith.addf %380, %381 : vector<8x4xf32>
    %c0_73 = arith.constant 0 : index
    %c0_74 = arith.constant 0 : index
    %383 = vector.load %arg7[%c0_73, %c0_74] : memref<8x4xf32, #tpu.memory_space<vmem>>, vector<8x4xf32>
    tpu.vector_store %arg7[%c0_73, %c0_74], %382 {strides = array<i32>} : memref<8x4xf32, #tpu.memory_space<vmem>>, vector<8x4xf32>,
    return
  }
}

</mosaic_0001>

<bundles_post_ra>
// kernel: improved_pt2_lstm_forward.1
= control target key start
LH: loop header
LB: loop body
LE: loop exit
PB: predicated region body
PF: predicated region fallthrough
CT: control target
= control target key end

     0   :  { %v2649_v0 = vmov 0   ;;  %vm242_vm0 = vcmask 1043456   ;;  %v2650_v20 = vmov 0.0   ;;  %vm229_vm1 = vcmask 64512   ;;  %s2652_s15 = smov 64   ;;  %s2653_s16 = smov 32   ;;  %s3204_s1 = inlined_call_operand.vmem [shape: f32[16,1,1], index: 1, kind: input, shape index: {}]   ;;  %s3205_s2 = inlined_call_operand.vmem [shape: bf16[8,64], index: 2, kind: input, shape index: {}]   ;;  %s3206_s3 = inlined_call_operand.vmem [shape: bf16[64,128], index: 3, kind: input, shape index: {}]   ;;  %s3207_s4 = inlined_call_operand.vmem [shape: bf16[3,32,128], index: 4, kind: input, shape index: {}]   ;;  %s3208_s0 = inlined_call_operand.vmem [shape: f32[8,8,8], index: 0, kind: input, shape index: {}]   ;;  %s3209_s6 = inlined_call_operand.vmem [shape: f32[4,128], index: 6, kind: input, shape index: {}]   ;;  %s3210_s5 = inlined_call_operand.vmem [shape: bf16[32,4], index: 5, kind: input, shape index: {}]   ;;  %s3211_s7 = inlined_call_operand.vmem [shape: f32[8,4], index: 7, kind: output, shape index: {}]  }
   0x1   :  { %2505 = vset.pattern.permute.xlu1 %v2649_v0  ;;  %2504 = vset.pattern.permute.xlu0 %v2649_v0  ;;  %v2059_v1 = vld [vmem:[%s3204_s1 + $0x2] ss:$0 sm:$0xff]  ;;  %v2057_v2 = vld [vmem:[%s3204_s1] ss:$0 sm:$0xff]  ;;  %v2060_v3 = vld [vmem:[%s3204_s1 + $0x3] ss:$0 sm:$0xff] }
   0x2   :  { %100 = vperm.xlu1 %2505, %v2059_v1   ;;  %92 = vperm.xlu0 %2504, %v2057_v2   ;;  %v2058_v4 = vld [vmem:[%s3204_s1 + $0x1] ss:$0 sm:$0xff]  ;;  %v2066_v5 = vld [vmem:[%s3204_s1 + $0x9] ss:$0 sm:$0xff]  ;;  %v2065_v6 = vld [vmem:[%s3204_s1 + $0x8] ss:$0 sm:$0xff] }
   0x3   :  { %v2068_v7 = vld [vmem:[%s3204_s1 + $0xb] ss:$0 sm:$0xff]  ;;  %v2067_v8 = vld [vmem:[%s3204_s1 + $0xa] ss:$0 sm:$0xff]  ;;  %v2062_v9 = vld [vmem:[%s3204_s1 + $0x5] ss:$0 sm:$0xff] }
   0x4   :  { %v2061_v10 = vld [vmem:[%s3204_s1 + $0x4] ss:$0 sm:$0xff]  ;;  %v224_v11 = vld [vmem:[%s3205_s2] sm:$0xf]  ;;  %v2064_v13 = vld [vmem:[%s3204_s1 + $0x7] ss:$0 sm:$0xff] }
   0x5   :  { %2498 = vmatprep.subr.msk.bf16.mxu0 %vm242_vm0, %v224_v11  ;;  %v244_v12 = vsel %vm242_vm0, %v224_v11, 0  ;;  %v2063_v14 = vld [vmem:[%s3204_s1 + $0x6] ss:$0 sm:$0xff]  ;;  %v2070_v15 = vld [vmem:[%s3204_s1 + $0xd] ss:$0 sm:$0xff]  ;;  %v29_v30 = vld [vmem:[%s3208_s0 + $0x10] sm:$0xff] }
   0x6   :  { %104 = vperm.xlu1 %2505, %v2060_v3   ;;  %96 = vperm.xlu0 %2504, %v2058_v4   ;;  %v2069_v16 = vld [vmem:[%s3204_s1 + $0xc] ss:$0 sm:$0xff]  ;;  %v2072_v17 = vld [vmem:[%s3204_s1 + $0xf] ss:$0 sm:$0xff]  ;;  %v2071_v18 = vld [vmem:[%s3204_s1 + $0xe] ss:$0 sm:$0xff] }
   0x7   :  { %2233 = vmatpush3.bf16.msra.mxu0 %v244_v12  ;;  %v2506_v19 = vld [vmem:[%s3206_s3] sm:$0xff]   ;;  %v2508_v21 = vld [vmem:[%s3206_s3 + $0x8] sm:$0xff]   ;;  %v30_v31 = vld [vmem:[%s3208_s0 + $0x18] sm:$0xff]  ;;  %vm2651_vm2 = vmmov 0   ;;  %vm360_vm3 = vcmask 523264   ;;  %vm470_vm7 = vcmask 261120  }
   0x8   :  { %2258 = vmatprep.subr.bf16.mxu0 %v2650_v20  ;;  %2242 = vmatprep.subr.bf16.mxu1 %v2506_v19  ;;  %v27_v24 = vld [vmem:[%s3208_s0] sm:$0xff]  ;;  %v28_v27 = vld [vmem:[%s3208_s0 + $0x8] sm:$0xff]  ;;  %v34_v57 = vld [vmem:[%s3208_s0 + $0x38] sm:$0xff]  ;;  %vm2051_vm8 = vcmask 31744  }
   0x9   :  { %2243 = vmatpush3.bf16.msra.mxu1 %v2506_v19  ;;  %v2770_v49 = vld [vmem:[%s3207_s4] sm:$0xff]   ;;  %v32_v51 = vld [vmem:[%s3208_s0 + $0x28] sm:$0xff]  ;;  %v33_v58 = vld [vmem:[%s3208_s0 + $0x30] sm:$0xff] }
   0xa   :  { %176 = vperm.xlu1 %2505, %v2066_v5   ;;  %172 = vperm.xlu0 %2504, %v2065_v6   ;;  %v31_v52 = vld [vmem:[%s3208_s0 + $0x20] sm:$0xff]  ;;  %v2509_v12 = vld [vmem:[%s3206_s3 + $0x10] sm:$0xff]  }
   0xb   :  { %2244 = vmatprep.subr.bf16.mxu1 %v2508_v21 }
   0xd   :  { %2245 = vmatpush3.bf16.msra.mxu1 %v2508_v21 }
   0xe   :  { %184 = vperm.xlu1 %2505, %v2068_v7   ;;  %180 = vperm.xlu0 %2504, %v2067_v8  }
   0xf   :  { %2246 = vmatprep.subr.bf16.mxu1 %v2509_v12 }
  0x11   :  { %2247 = vmatpush3.bf16.msra.mxu1 %v2509_v12 }
  0x12   :  { %112 = vperm.xlu1 %2505, %v2062_v9   ;;  %108 = vperm.xlu0 %2504, %v2061_v10  }
  0x16   :  { %120 = vperm.xlu1 %2505, %v2064_v13   ;;  %116 = vperm.xlu0 %2504, %v2063_v14   ;;  %v2511_v13 = vld [vmem:[%s3206_s3 + $0x18] sm:$0xff]   ;;  %v2798_v14 = vld [vmem:[%s3207_s4 + $0x8] sm:$0xff]  }
  0x17   :  { %2248 = vmatprep.subr.bf16.mxu1 %v2511_v13 }
  0x18   :  { %2249 = vmatpush3.bf16.msra.mxu1 %v2511_v13 }
  0x19   :  { %2282 = vmatprep.subr.bf16.mxu1 %v2650_v20 }
  0x1a   :  { %192 = vperm.xlu1 %2505, %v2070_v15   ;;  %188 = vperm.xlu0 %2504, %v2069_v16   ;;  %v2073_v15 = vld [vmem:[%s3209_s6] ss:$0 sm:$0xff] }
  0x1e   :  { %200 = vperm.xlu1 %2505, %v2072_v17   ;;  %196 = vperm.xlu0 %2504, %v2071_v18  }
  0x81   :  { %v101_v22 = vpop.permute.xlu1 %100  ;;  %v93_v23 = vpop.permute.xlu0 %92 }
  0x82   :  { %v123_v28 = vmul.f32 %v93_v23, %v27_v24  ;;  %v125_v36 = vmul.f32 %v101_v22, %v29_v30 }
  0x85   :  { %v105_v25 = vpop.permute.xlu1 %104  ;;  %v97_v26 = vpop.permute.xlu0 %96 }
  0x86   :  { %v124_v29 = vmul.f32 %v97_v26, %v28_v27  ;;  %v126_v37 = vmul.f32 %v105_v25, %v30_v31 }
  0x89   :  { %v177_v32 = vpop.permute.xlu1 %176  ;;  %v173_v33 = vpop.permute.xlu0 %172 }
  0x8a   :  { %v204_v34 = vadd.f32 %v177_v32, %v124_v29  ;;  %v203_v35 = vadd.f32 %v173_v33, %v123_v28 }
  0x8c   :  { %v212_v38 = vmax.f32 %v204_v34, 0.0  ;;  %v211_v39 = vmax.f32 %v203_v35, 0.0 }
  0x8d   :  { %v185_v40 = vpop.permute.xlu1 %184  ;;  %v181_v41 = vpop.permute.xlu0 %180 }
  0x8e   :  { %v206_v42 = vadd.f32 %v185_v40, %v126_v37  ;;  %v205_v43 = vadd.f32 %v181_v41, %v125_v36  ;;  %v220_v44 = vpack.c.bf16 %v212_v38, %v211_v39 }
  0x90   :  { %v214_v45 = vmax.f32 %v206_v42, 0.0  ;;  %v213_v46 = vmax.f32 %v205_v43, 0.0  ;;  %2234 = vmatprep.mubr.msk.bf16.mxu0 %vm229_vm1, %v220_v44 }
  0x91   :  { %v113_v47 = vpop.permute.xlu1 %112  ;;  %v109_v48 = vpop.permute.xlu0 %108 }
  0x92   :  { %v221_v50 = vpack.c.bf16 %v214_v45, %v213_v46  ;;  %v128_v55 = vmul.f32 %v113_v47, %v32_v51  ;;  %v127_v56 = vmul.f32 %v109_v48, %v31_v52 }
  0x94   :  { %2235 = vmatmul.mubr.msk.bf16.vlgmr.msra.gmra.mrb[0].mxu0 %vm229_vm1, %v221_v50  ;;  %v2078_v50 = vld [vmem:[%s3209_s6 + $0x2] ss:$0 sm:$0xff] }
  0x95   :  { %v121_v53 = vpop.permute.xlu1 %120  ;;  %v117_v54 = vpop.permute.xlu0 %116  ;;  %2259 = vmatpush3.bf16.msra.mxu0 %v2770_v49 }
  0x96   :  { %2260 = vmatprep.subr.bf16.mxu0 %v2650_v20  ;;  %v130_v63 = vmul.f32 %v121_v53, %v34_v57  ;;  %v129_v1 = vmul.f32 %v117_v54, %v33_v58 }
  0x99   :  { %v193_v59 = vpop.permute.xlu1 %192  ;;  %v189_v60 = vpop.permute.xlu0 %188  ;;  %2261 = vmatpush3.bf16.msra.mxu0 %v2798_v14 }
  0x9a   :  { %v208_v61 = vadd.f32 %v193_v59, %v128_v55  ;;  %v207_v62 = vadd.f32 %v189_v60, %v127_v56  ;;  %2266 = vmatprep.subr.bf16.mxu0 %v2650_v20 }
  0x9c   :  { %v216_v2 = vmax.f32 %v208_v61, 0.0  ;;  %v215_v3 = vmax.f32 %v207_v62, 0.0 }
  0x9d   :  { %v201_v4 = vpop.permute.xlu1 %200  ;;  %v197_v5 = vpop.permute.xlu0 %196 }
  0x9e   :  { %v222_v6 = vpack.c.bf16 %v216_v2, %v215_v3  ;;  %v210_v7 = vadd.f32 %v201_v4, %v130_v63  ;;  %v209_v8 = vadd.f32 %v197_v5, %v129_v1  ;;  %v453_v4 = vlaneseq }
  0xa0   :  { %v218_v9 = vmax.f32 %v210_v7, 0.0  ;;  %v217_v10 = vmax.f32 %v209_v8, 0.0  ;;  %2238 = vmatprep.mubr.msk.bf16.mxu0 %vm229_vm1, %v222_v6 }
  0xa2   :  { %v223_v11 = vpack.c.bf16 %v218_v9, %v217_v10  ;;  %v454_v9 = vand.u32 127, %v453_v4  ;;  %v2517_v10 = vld [vmem:[%s3210_s5 + $0x8] sm:$0xff]  }
  0xa4   :  { %2239 = vmatmul.mubr.msk.bf16.gmra.mrb[4].mxu0 %vm229_vm1, %v223_v11  ;;  %vm455_vm4 = vcmp.ge.s32.totalorder %v454_v9, 64  ;;  %vm456_vm5 = vcmp.lt.s32.totalorder %v454_v9, 96 }
  0xa5   :  { %2262 = vmatprep.mubr.msk.bf16.mxu0 %vm2651_vm2, %v2650_v20  ;;  %vm2838_vm6 = vmand %vm455_vm4, %vm456_vm5 }
  0xac   :  { %2263 = vmatmul.mubr.bf16.vlgmr.msra.gmra.mrb[8].mxu0 %v2649_v0 }
  0xad   :  { %2270 = vmatprep.mubr.msk.bf16.mxu0 %vm2651_vm2, %v2650_v20 }
 0x167   :  { %v2236_v16 = vpop.f32.mrb[0].mxu0 }
 0x168   :  { %v289_v17 = vadd.f32 %v2236_v16, %v2073_v15  ;;  %v280_v18 = vpop.f32.mrb[1].mxu0 }
 0x169   :  { %v281_v19 = vadd.f32 %v2073_v15, %v280_v18  ;;  %v2237_v21 = vpop.f32.mrb[2].mxu0 }
 0x16a   :  { %v292_v22 = vadd.f32 %v2237_v21, %v2073_v15  ;;  %v283_v23 = vpop.f32.mrb[3].mxu0  ;;  %v313_v25 = vmax.f32 %v289_v17, 0.0  ;;  %v2852_v21 = vld [vmem:[%s3207_s4 + $0x20] sm:$0xff]  }
 0x16b   :  { %v284_v24 = vadd.f32 %v2073_v15, %v283_v23  ;;  %v311_v27 = vmax.f32 %v281_v19, 0.0  ;;  %2267 = vmatpush3.bf16.msra.mxu0 %v2852_v21 }
 0x16c   :  { %v314_v26 = vmax.f32 %v292_v22, 0.0  ;;  %v2858_v22 = vld [vmem:[%s3207_s4 + $0x28] sm:$0xff]   ;;  %2268 = vmatprep.subr.bf16.mxu0 %v2650_v20 }
 0x16d   :  { %v312_v28 = vmax.f32 %v284_v24, 0.0 }
 0x16e   :  { %v321_v29 = vpack.c.bf16 %v314_v26, %v313_v25 }
 0x16f   :  { %v320_v30 = vpack.c.bf16 %v312_v28, %v311_v27  ;;  %2269 = vmatpush3.bf16.msra.mxu0 %v2858_v22  ;;  %v2868_v27 = vld [vmem:[%s3207_s4 + $0x10] sm:$0xff]  }
 0x170   :  { %2274 = vmatprep.subr.bf16.mxu0 %v2650_v20 }
 0x171   :  { %2250 = vmatprep.mubr.msk.bf16.mxu1 %vm360_vm3, %v320_v30 }
 0x172   :  { %2251 = vmatmul.mubr.msk.bf16.vlgmr.msra.gmra.mrb[0].mxu1 %vm360_vm3, %v321_v29  ;;  %v2876_v29 = vld [vmem:[%s3207_s4 + $0x18] sm:$0xff]  }
 0x173   :  { %2283 = vmatpush3.bf16.msra.mxu1 %v2770_v49 }
 0x174   :  { %2284 = vmatprep.subr.bf16.mxu1 %v2650_v20 }
 0x177   :  { %v2240_v31 = vpop.f32.mrb[4].mxu0  ;;  %2285 = vmatpush3.bf16.msra.mxu1 %v2798_v14 }
 0x178   :  { %v305_v32 = vadd.f32 %v2240_v31, %v2073_v15  ;;  %v296_v33 = vpop.f32.mrb[5].mxu0  ;;  %2290 = vmatprep.subr.bf16.mxu1 %v2650_v20 }
 0x179   :  { %v297_v34 = vadd.f32 %v2073_v15, %v296_v33  ;;  %v2241_v35 = vpop.f32.mrb[6].mxu0 }
 0x17a   :  { %v308_v36 = vadd.f32 %v2241_v35, %v2073_v15  ;;  %v299_v37 = vpop.f32.mrb[7].mxu0  ;;  %v317_v39 = vmax.f32 %v305_v32, 0.0 }
 0x17b   :  { %v300_v38 = vadd.f32 %v2073_v15, %v299_v37  ;;  %v315_v41 = vmax.f32 %v297_v34, 0.0 }
 0x17c   :  { %v318_v40 = vmax.f32 %v308_v36, 0.0 }
 0x17d   :  { %v316_v42 = vmax.f32 %v300_v38, 0.0 }
 0x17e   :  { %v323_v43 = vpack.c.bf16 %v318_v40, %v317_v39 }
 0x17f   :  { %v322_v44 = vpack.c.bf16 %v316_v42, %v315_v41  ;;  %v508_v45 = vpop.f32.mrb[8].mxu0 }
 0x180   :  { %v2264_v46 = vpop.f32.mrb[9].mxu0 }
 0x181   :  { %2254 = vmatprep.mubr.msk.bf16.mxu1 %vm360_vm3, %v322_v44  ;;  %v511_v47 = vpop.f32.mrb[10].mxu0 }
 0x182   :  { %2255 = vmatmul.mubr.msk.bf16.gmra.mrb[4].mxu1 %vm360_vm3, %v323_v43  ;;  %v2265_v48 = vpop.f32.mrb[11].mxu0 }
 0x183   :  { %2286 = vmatprep.mubr.msk.bf16.mxu1 %vm2651_vm2, %v2650_v20 }
 0x245   :  { %v2252_v51 = vpop.f32.mrb[0].mxu1 }
 0x246   :  { %v2824_v52 = vadd.f32 %v2252_v51, %v2078_v50  ;;  %v407_v53 = vpop.f32.mrb[1].mxu1 }
 0x247   :  { %v408_v54 = vadd.f32 %v2078_v50, %v407_v53  ;;  %v2253_v55 = vpop.f32.mrb[2].mxu1 }
 0x248   :  { %v2826_v56 = vadd.f32 %v2253_v55, %v2078_v50  ;;  %v410_v57 = vpop.f32.mrb[3].mxu1 }
 0x249   :  { %v514_v58 = vadd.f32 %v508_v45, %v408_v54  ;;  %v2828_v59 = vadd.f32 %v2078_v50, %v410_v57 }
 0x24b   :  { %v2097_v60 = vmul.f32 -1.442695, %v514_v58 }
 0x24d   :  { %2518 = vpow2.f32 %v2097_v60 }
 0x24e   :  { %2520 = vtanh.f32 %v514_v58 }
 0x255   :  { %v2256_v61 = vpop.f32.mrb[4].mxu1 }
 0x256   :  { %v2830_v62 = vadd.f32 %v2256_v61, %v2078_v50  ;;  %v423_v63 = vpop.f32.mrb[5].mxu1 }
 0x257   :  { %v2519_v1 = vpop.eup %2518  ;;  %v2832_v2 = vadd.f32 %v2078_v50, %v423_v63  ;;  %v2257_v3 = vpop.f32.mrb[6].mxu1 }
 0x258   :  { %v519_v5 = vadd.f32 1.0, %v2519_v1  ;;  %v2834_v6 = vadd.f32 %v2257_v3, %v2078_v50  ;;  %v426_v7 = vpop.f32.mrb[7].mxu1  ;;  %v2521_v11 = vpop.eup %2520 }
 0x259   :  { %v2836_v8 = vadd.f32 %v2078_v50, %v426_v7 }
 0x25a   :  { %2522 = vrcp.f32 %v519_v5 }
 0x264   :  { %v2523_v12 = vpop.eup %2522 }
 0x265   :  { %v522_v13 = vsel %vm2838_vm6, %v2521_v11, %v2523_v12 }
 0x266   :  { %525 = vrot.lane.b32.xlu0 %v522_v13, %s2652_s15  ;;  %v523_v17 = vmul.f32 0.0, %v522_v13 }
 0x2d8   :  { %v526_v15 = vpop.permute.xlu0 %525 }
 0x2d9   :  { %v528_v16 = vmul.f32 %v526_v15, %v522_v13 }
 0x2db   :  { %530 = vrot.lane.b32.xlu1 %v528_v16, %s2653_s16 }
 0x34d   :  { %v531_v18 = vpop.permute.xlu1 %530 }
 0x34e   :  { %v2846_v19 = vadd.f32 %v531_v18, %v523_v17 }
 0x350   :  { %2524 = vtanh.f32 %v2846_v19 }
 0x35a   :  { %v2525_v23 = vpop.eup %2524 }
 0x35b   :  { %536 = vrot.lane.b32.xlu0 %v2525_v23, %s2652_s15 }
 0x3cd   :  { %v537_v24 = vpop.permute.xlu0 %536 }
 0x3ce   :  { %v539_v25 = vmul.f32 %v537_v24, %v522_v13 }
 0x3d0   :  { %v540_v26 = vpack.c.bf16 %v539_v25, %v539_v25 }
 0x3d2   :  { %546 = vrot.lane.b32.xlu1 %v540_v26, %s2653_s16 }
 0x444   :  { %v547_v28 = vpop.permute.xlu1 %546 }
 0x445   :  { %2271 = vmatmul.mubr.msk.bf16.vlgmr.msra.gmra.mrb[12].mxu0 %vm470_vm7, %v547_v28  ;;  %2287 = vmatmul.mubr.msk.bf16.vlgmr.msra.gmra.mrb[8].mxu1 %vm470_vm7, %v547_v28 }
 0x446   :  { %2275 = vmatpush3.bf16.msra.mxu0 %v2868_v27  ;;  %2278 = vmatprep.mubr.msk.bf16.mxu0 %vm2651_vm2, %v2650_v20 }
 0x447   :  { %2276 = vmatprep.subr.bf16.mxu0 %v2650_v20  ;;  %2291 = vmatpush3.bf16.msra.mxu1 %v2852_v21 }
 0x448   :  { %2292 = vmatprep.subr.bf16.mxu1 %v2650_v20  ;;  %2294 = vmatprep.mubr.msk.bf16.mxu1 %vm2651_vm2, %v2650_v20 }
 0x44a   :  { %2277 = vmatpush3.bf16.msra.mxu0 %v2876_v29 }
 0x44b   :  { %2306 = vmatprep.subr.bf16.mxu0 %v2650_v20  ;;  %2293 = vmatpush3.bf16.msra.mxu1 %v2858_v22 }
 0x44c   :  { %2298 = vmatprep.subr.bf16.mxu1 %v2650_v20 }
 0x451   :  { %2279 = vmatmul.mubr.bf16.vlgmr.msra.gmra.mrb[12].mxu0 %v2649_v0  ;;  %v2900_v0 = vld [vmem:[%s3209_s6 + $0x3] ss:$0 sm:$0xff] }
 0x452   :  { %2307 = vmatpush3.bf16.msra.mxu0 %v2770_v49  ;;  %2310 = vmatprep.mubr.msk.bf16.mxu0 %vm2651_vm2, %v2650_v20 }
 0x453   :  { %2308 = vmatprep.subr.bf16.mxu0 %v2650_v20 }
 0x456   :  { %2309 = vmatpush3.bf16.msra.mxu0 %v2798_v14 }
 0x457   :  { %2314 = vmatprep.subr.bf16.mxu0 %v2650_v20 }
 0x518   :  { %v716_v30 = vpop.f32.mrb[8].mxu1 }
 0x519   :  { %v722_v31 = vadd.f32 %v716_v30, %v2828_v59  ;;  %v2288_v32 = vpop.f32.mrb[9].mxu1 }
 0x51a   :  { %v719_v33 = vpop.f32.mrb[10].mxu1 }
 0x51b   :  { %v2106_v34 = vmul.f32 -1.442695, %v722_v31  ;;  %v2289_v35 = vpop.f32.mrb[11].mxu1 }
 0x51d   :  { %2526 = vpow2.f32 %v2106_v34 }
 0x51e   :  { %2528 = vtanh.f32 %v722_v31 }
 0x524   :  { %v649_v36 = vpop.f32.mrb[12].mxu0 }
 0x525   :  { %v2458_v37 = vadd.f32 %v2900_v0, %v649_v36  ;;  %v2280_v38 = vpop.f32.mrb[13].mxu0 }
 0x526   :  { %v652_v39 = vpop.f32.mrb[14].mxu0 }
 0x527   :  { %v2527_v40 = vpop.eup %2526  ;;  %v2104_v41 = vmul.f32 -1.442695, %v2458_v37  ;;  %v2281_v42 = vpop.f32.mrb[15].mxu0 }
 0x528   :  { %v727_v43 = vadd.f32 1.0, %v2527_v40  ;;  %v2529_v44 = vpop.eup %2528 }
 0x529   :  { %2530 = vpow2.f32 %v2104_v41 }
 0x52a   :  { %2532 = vrcp.f32 %v727_v43 }
 0x52b   :  { %2534 = vtanh.f32 %v2458_v37 }
 0x533   :  { %v2531_v45 = vpop.eup %2530 }
 0x534   :  { %v2533_v46 = vpop.eup %2532  ;;  %v660_v47 = vadd.f32 1.0, %v2531_v45 }
 0x535   :  { %v730_v48 = vsel %vm2838_vm6, %v2529_v44, %v2533_v46  ;;  %v2535_v50 = vpop.eup %2534 }
 0x536   :  { %2536 = vrcp.f32 %v660_v47  ;;  %733 = vrot.lane.b32.xlu0 %v730_v48, %s2652_s15  ;;  %v731_v59 = vmul.f32 %v730_v48, %v2846_v19 }
 0x540   :  { %v2537_v51 = vpop.eup %2536 }
 0x541   :  { %v663_v53 = vsel %vm2838_vm6, %v2535_v50, %v2537_v51 }
 0x542   :  { %666 = vrot.lane.b32.xlu1 %v663_v53, %s2652_s15  ;;  %v664_v63 = vmul.f32 0.0, %v663_v53 }
 0x5a8   :  { %v734_v54 = vpop.permute.xlu0 %733 }
 0x5a9   :  { %v736_v55 = vmul.f32 %v734_v54, %v730_v48 }
 0x5ab   :  { %738 = vrot.lane.b32.xlu0 %v736_v55, %s2653_s16 }
 0x5b4   :  { %v667_v57 = vpop.permute.xlu1 %666 }
 0x5b5   :  { %v669_v58 = vmul.f32 %v667_v57, %v663_v53 }
 0x5b7   :  { %671 = vrot.lane.b32.xlu1 %v669_v58, %s2653_s16 }
 0x61d   :  { %v739_v60 = vpop.permute.xlu0 %738 }
 0x61e   :  { %v2912_v61 = vadd.f32 %v739_v60, %v731_v59 }
 0x620   :  { %2538 = vtanh.f32 %v2912_v61 }
 0x629   :  { %v672_v1 = vpop.permute.xlu1 %671 }
 0x62a   :  { %v2539_v3 = vpop.eup %2538  ;;  %v2915_v4 = vadd.f32 %v672_v1, %v664_v63 }
 0x62b   :  { %744 = vrot.lane.b32.xlu0 %v2539_v3, %s2652_s15 }
 0x62c   :  { %2540 = vtanh.f32 %v2915_v4 }
 0x636   :  { %v2541_v5 = vpop.eup %2540 }
 0x637   :  { %677 = vrot.lane.b32.xlu1 %v2541_v5, %s2652_s15 }
 0x69d   :  { %v745_v7 = vpop.permute.xlu0 %744 }
 0x69e   :  { %v747_v9 = vmul.f32 %v745_v7, %v730_v48 }
 0x6a0   :  { %v748_v11 = vpack.c.bf16 %v747_v9, %v747_v9 }
 0x6a2   :  { %750 = vrot.lane.b32.xlu0 %v748_v11, %s2653_s16 }
 0x6a9   :  { %v678_v12 = vpop.permute.xlu1 %677 }
 0x6aa   :  { %v680_v13 = vmul.f32 %v678_v12, %v663_v53 }
 0x6ac   :  { %v681_v15 = vpack.c.bf16 %v680_v13, %v680_v13 }
 0x6ae   :  { %796 = vrot.lane.b32.xlu1 %v681_v15, %s2653_s16 }
 0x714   :  { %v751_v16 = vpop.permute.xlu0 %750 }
 0x715   :  { %2295 = vmatmul.mubr.msk.bf16.vlgmr.msra.gmra.mrb[12].mxu1 %vm470_vm7, %v751_v16  ;;  %2311 = vmatmul.mubr.msk.bf16.vlgmr.msra.gmra.mrb[16].mxu0 %vm470_vm7, %v751_v16 }
 0x716   :  { %2299 = vmatpush3.bf16.msra.mxu1 %v2868_v27  ;;  %2302 = vmatprep.mubr.msk.bf16.mxu1 %vm2651_vm2, %v2650_v20 }
 0x717   :  { %2300 = vmatprep.subr.bf16.mxu1 %v2650_v20  ;;  %2315 = vmatpush3.bf16.msra.mxu0 %v2852_v21 }
 0x718   :  { %2316 = vmatprep.subr.bf16.mxu0 %v2650_v20  ;;  %2318 = vmatprep.mubr.msk.bf16.mxu0 %vm2651_vm2, %v2650_v20 }
 0x71a   :  { %2301 = vmatpush3.bf16.msra.mxu1 %v2876_v29 }
 0x71b   :  { %2330 = vmatprep.subr.bf16.mxu1 %v2650_v20  ;;  %2317 = vmatpush3.bf16.msra.mxu0 %v2858_v22 }
 0x71c   :  { %2322 = vmatprep.subr.bf16.mxu0 %v2650_v20 }
 0x720   :  { %v797_v17 = vpop.permute.xlu1 %796 }
 0x721   :  { %2303 = vmatmul.mubr.msk.bf16.vlgmr.msra.gmra.mrb[12].mxu1 %vm470_vm7, %v797_v17 }
 0x722   :  { %2331 = vmatpush3.bf16.msra.mxu1 %v2770_v49  ;;  %2334 = vmatprep.mubr.msk.bf16.mxu1 %vm2651_vm2, %v2650_v20 }
 0x723   :  { %2332 = vmatprep.subr.bf16.mxu1 %v2650_v20 }
 0x726   :  { %2333 = vmatpush3.bf16.msra.mxu1 %v2798_v14 }
 0x727   :  { %2338 = vmatprep.subr.bf16.mxu1 %v2650_v20 }
 0x7e8   :  { %v902_v18 = vpop.f32.mrb[16].mxu0 }
 0x7e9   :  { %v908_v19 = vadd.f32 %v902_v18, %v2824_v52  ;;  %v2312_v23 = vpop.f32.mrb[17].mxu0 }
 0x7ea   :  { %v905_v24 = vpop.f32.mrb[18].mxu0 }
 0x7eb   :  { %v2111_v25 = vmul.f32 -1.442695, %v908_v19  ;;  %v2313_v26 = vpop.f32.mrb[19].mxu0 }
 0x7ed   :  { %2542 = vpow2.f32 %v2111_v25 }
 0x7ee   :  { %2544 = vtanh.f32 %v908_v19 }
 0x7f4   :  { %v835_v28 = vpop.f32.mrb[12].mxu1 }
 0x7f5   :  { %v2459_v30 = vadd.f32 %v2900_v0, %v835_v28  ;;  %v2304_v31 = vpop.f32.mrb[13].mxu1 }
 0x7f6   :  { %v838_v32 = vpop.f32.mrb[14].mxu1 }
 0x7f7   :  { %v2543_v33 = vpop.eup %2542  ;;  %v2109_v34 = vmul.f32 -1.442695, %v2459_v30  ;;  %v2305_v35 = vpop.f32.mrb[15].mxu1 }
 0x7f8   :  { %v913_v36 = vadd.f32 1.0, %v2543_v33  ;;  %v2545_v37 = vpop.eup %2544 }
 0x7f9   :  { %2546 = vpow2.f32 %v2109_v34 }
 0x7fa   :  { %2548 = vrcp.f32 %v913_v36 }
 0x7fb   :  { %2550 = vtanh.f32 %v2459_v30 }
 0x803   :  { %v2547_v38 = vpop.eup %2546 }
 0x804   :  { %v2549_v52 = vpop.eup %2548  ;;  %v846_v39 = vadd.f32 1.0, %v2547_v38 }
 0x805   :  { %v916_v40 = vsel %vm2838_vm6, %v2545_v37, %v2549_v52  ;;  %v2551_v41 = vpop.eup %2550 }
 0x806   :  { %2552 = vrcp.f32 %v846_v39  ;;  %919 = vrot.lane.b32.xlu0 %v916_v40, %s2652_s15  ;;  %v917_v48 = vmul.f32 %v916_v40, %v2912_v61 }
 0x810   :  { %v2553_v42 = vpop.eup %2552 }
 0x811   :  { %v849_v43 = vsel %vm2838_vm6, %v2551_v41, %v2553_v42 }
 0x812   :  { %852 = vrot.lane.b32.xlu1 %v849_v43, %s2652_s15  ;;  %v850_v53 = vmul.f32 %v849_v43, %v2915_v4 }
 0x878   :  { %v920_v44 = vpop.permute.xlu0 %919 }
 0x879   :  { %v922_v45 = vmul.f32 %v920_v44, %v916_v40 }
 0x87b   :  { %924 = vrot.lane.b32.xlu0 %v922_v45, %s2653_s16 }
 0x884   :  { %v853_v46 = vpop.permute.xlu1 %852 }
 0x885   :  { %v855_v47 = vmul.f32 %v853_v46, %v849_v43 }
 0x887   :  { %857 = vrot.lane.b32.xlu1 %v855_v47, %s2653_s16 }
 0x8ed   :  { %v925_v50 = vpop.permute.xlu0 %924 }
 0x8ee   :  { %v2954_v51 = vadd.f32 %v925_v50, %v917_v48 }
 0x8f0   :  { %2554 = vtanh.f32 %v2954_v51 }
 0x8f9   :  { %v858_v54 = vpop.permute.xlu1 %857 }
 0x8fa   :  { %v2555_v55 = vpop.eup %2554  ;;  %v2958_v57 = vadd.f32 %v858_v54, %v850_v53 }
 0x8fb   :  { %930 = vrot.lane.b32.xlu0 %v2555_v55, %s2652_s15 }
 0x8fc   :  { %2556 = vtanh.f32 %v2958_v57 }
 0x906   :  { %v2557_v58 = vpop.eup %2556 }
 0x907   :  { %863 = vrot.lane.b32.xlu1 %v2557_v58, %s2652_s15 }
 0x96d   :  { %v931_v59 = vpop.permute.xlu0 %930 }
 0x96e   :  { %v933_v60 = vmul.f32 %v931_v59, %v916_v40 }
 0x970   :  { %v934_v61 = vpack.c.bf16 %v933_v60, %v933_v60 }
 0x972   :  { %936 = vrot.lane.b32.xlu0 %v934_v61, %s2653_s16 }
 0x979   :  { %v864_v63 = vpop.permute.xlu1 %863 }
 0x97a   :  { %v866_v1 = vmul.f32 %v864_v63, %v849_v43 }
 0x97c   :  { %v867_v3 = vpack.c.bf16 %v866_v1, %v866_v1 }
 0x97e   :  { %982 = vrot.lane.b32.xlu1 %v867_v3, %s2653_s16 }
 0x9e4   :  { %v937_v4 = vpop.permute.xlu0 %936 }
 0x9e5   :  { %2319 = vmatmul.mubr.msk.bf16.vlgmr.msra.gmra.mrb[20].mxu0 %vm470_vm7, %v937_v4  ;;  %2335 = vmatmul.mubr.msk.bf16.vlgmr.msra.gmra.mrb[16].mxu1 %vm470_vm7, %v937_v4 }
 0x9e6   :  { %2323 = vmatpush3.bf16.msra.mxu0 %v2868_v27  ;;  %2326 = vmatprep.mubr.msk.bf16.mxu0 %vm2651_vm2, %v2650_v20 }
 0x9e7   :  { %2324 = vmatprep.subr.bf16.mxu0 %v2650_v20  ;;  %2339 = vmatpush3.bf16.msra.mxu1 %v2852_v21 }
 0x9e8   :  { %2340 = vmatprep.subr.bf16.mxu1 %v2650_v20  ;;  %2342 = vmatprep.mubr.msk.bf16.mxu1 %vm2651_vm2, %v2650_v20 }
 0x9ea   :  { %2325 = vmatpush3.bf16.msra.mxu0 %v2876_v29 }
 0x9eb   :  { %2354 = vmatprep.subr.bf16.mxu0 %v2650_v20  ;;  %2341 = vmatpush3.bf16.msra.mxu1 %v2858_v22 }
 0x9ec   :  { %2346 = vmatprep.subr.bf16.mxu1 %v2650_v20 }
 0x9f0   :  { %v983_v5 = vpop.permute.xlu1 %982 }
 0x9f1   :  { %2327 = vmatmul.mubr.msk.bf16.vlgmr.msra.gmra.mrb[20].mxu0 %vm470_vm7, %v983_v5 }
 0x9f2   :  { %2355 = vmatpush3.bf16.msra.mxu0 %v2770_v49  ;;  %2358 = vmatprep.mubr.msk.bf16.mxu0 %vm2651_vm2, %v2650_v20 }
 0x9f3   :  { %2356 = vmatprep.subr.bf16.mxu0 %v2650_v20 }
 0x9f6   :  { %2357 = vmatpush3.bf16.msra.mxu0 %v2798_v14 }
 0x9f7   :  { %2362 = vmatprep.subr.bf16.mxu0 %v2650_v20 }
 0xab8   :  { %v1088_v7 = vpop.f32.mrb[16].mxu1 }
 0xab9   :  { %v1094_v9 = vadd.f32 %v1088_v7, %v2826_v56  ;;  %v2336_v11 = vpop.f32.mrb[17].mxu1 }
 0xaba   :  { %v1091_v12 = vpop.f32.mrb[18].mxu1 }
 0xabb   :  { %v2116_v13 = vmul.f32 -1.442695, %v1094_v9  ;;  %v2337_v15 = vpop.f32.mrb[19].mxu1 }
 0xabd   :  { %2558 = vpow2.f32 %v2116_v13 }
 0xabe   :  { %2560 = vtanh.f32 %v1094_v9 }
 0xac4   :  { %v1021_v16 = vpop.f32.mrb[20].mxu0 }
 0xac5   :  { %v2460_v17 = vadd.f32 %v2900_v0, %v1021_v16  ;;  %v2328_v18 = vpop.f32.mrb[21].mxu0 }
 0xac6   :  { %v1024_v19 = vpop.f32.mrb[22].mxu0 }
 0xac7   :  { %v2559_v23 = vpop.eup %2558  ;;  %v2114_v24 = vmul.f32 -1.442695, %v2460_v17  ;;  %v2329_v25 = vpop.f32.mrb[23].mxu0 }
 0xac8   :  { %v1099_v26 = vadd.f32 1.0, %v2559_v23  ;;  %v2561_v28 = vpop.eup %2560 }
 0xac9   :  { %2562 = vpow2.f32 %v2114_v24 }
 0xaca   :  { %2564 = vrcp.f32 %v1099_v26 }
 0xacb   :  { %2566 = vtanh.f32 %v2460_v17 }
 0xad3   :  { %v2563_v30 = vpop.eup %2562 }
 0xad4   :  { %v2565_v56 = vpop.eup %2564  ;;  %v1032_v31 = vadd.f32 1.0, %v2563_v30 }
 0xad5   :  { %v1102_v32 = vsel %vm2838_vm6, %v2561_v28, %v2565_v56  ;;  %v2567_v33 = vpop.eup %2566 }
 0xad6   :  { %2568 = vrcp.f32 %v1032_v31  ;;  %1105 = vrot.lane.b32.xlu0 %v1102_v32, %s2652_s15  ;;  %v1103_v39 = vmul.f32 %v1102_v32, %v2954_v51 }
 0xae0   :  { %v2569_v34 = vpop.eup %2568 }
 0xae1   :  { %v1035_v35 = vsel %vm2838_vm6, %v2567_v33, %v2569_v34 }
 0xae2   :  { %1038 = vrot.lane.b32.xlu1 %v1035_v35, %s2652_s15  ;;  %v1036_v42 = vmul.f32 %v1035_v35, %v2958_v57 }
 0xb48   :  { %v1106_v36 = vpop.permute.xlu0 %1105 }
 0xb49   :  { %v1108_v37 = vmul.f32 %v1106_v36, %v1102_v32 }
 0xb4b   :  { %1110 = vrot.lane.b32.xlu0 %v1108_v37, %s2653_s16 }
 0xb54   :  { %v1039_v38 = vpop.permute.xlu1 %1038 }
 0xb55   :  { %v1041_v52 = vmul.f32 %v1039_v38, %v1035_v35 }
 0xb57   :  { %1043 = vrot.lane.b32.xlu1 %v1041_v52, %s2653_s16 }
 0xbbd   :  { %v1111_v40 = vpop.permute.xlu0 %1110 }
 0xbbe   :  { %v2997_v41 = vadd.f32 %v1111_v40, %v1103_v39 }
 0xbc0   :  { %2570 = vtanh.f32 %v2997_v41 }
 0xbc9   :  { %v1044_v43 = vpop.permute.xlu1 %1043 }
 0xbca   :  { %v2571_v44 = vpop.eup %2570  ;;  %v3001_v45 = vadd.f32 %v1044_v43, %v1036_v42 }
 0xbcb   :  { %1116 = vrot.lane.b32.xlu0 %v2571_v44, %s2652_s15 }
 0xbcc   :  { %2572 = vtanh.f32 %v3001_v45 }
 0xbd6   :  { %v2573_v46 = vpop.eup %2572 }
 0xbd7   :  { %1049 = vrot.lane.b32.xlu1 %v2573_v46, %s2652_s15 }
 0xc3d   :  { %v1117_v47 = vpop.permute.xlu0 %1116 }
 0xc3e   :  { %v1119_v48 = vmul.f32 %v1117_v47, %v1102_v32 }
 0xc40   :  { %v1120_v50 = vpack.c.bf16 %v1119_v48, %v1119_v48 }
 0xc42   :  { %1122 = vrot.lane.b32.xlu0 %v1120_v50, %s2653_s16 }
 0xc49   :  { %v1050_v51 = vpop.permute.xlu1 %1049 }
 0xc4a   :  { %v1052_v53 = vmul.f32 %v1050_v51, %v1035_v35 }
 0xc4c   :  { %v1053_v54 = vpack.c.bf16 %v1052_v53, %v1052_v53 }
 0xc4e   :  { %1168 = vrot.lane.b32.xlu1 %v1053_v54, %s2653_s16 }
 0xcb4   :  { %v1123_v55 = vpop.permute.xlu0 %1122 }
 0xcb5   :  { %2343 = vmatmul.mubr.msk.bf16.vlgmr.msra.gmra.mrb[20].mxu1 %vm470_vm7, %v1123_v55  ;;  %2359 = vmatmul.mubr.msk.bf16.vlgmr.msra.gmra.mrb[24].mxu0 %vm470_vm7, %v1123_v55 }
 0xcb6   :  { %2347 = vmatpush3.bf16.msra.mxu1 %v2868_v27  ;;  %2350 = vmatprep.mubr.msk.bf16.mxu1 %vm2651_vm2, %v2650_v20 }
 0xcb7   :  { %2348 = vmatprep.subr.bf16.mxu1 %v2650_v20  ;;  %2363 = vmatpush3.bf16.msra.mxu0 %v2852_v21 }
 0xcb8   :  { %2364 = vmatprep.subr.bf16.mxu0 %v2650_v20  ;;  %2366 = vmatprep.mubr.msk.bf16.mxu0 %vm2651_vm2, %v2650_v20 }
 0xcba   :  { %2349 = vmatpush3.bf16.msra.mxu1 %v2876_v29 }
 0xcbb   :  { %2378 = vmatprep.subr.bf16.mxu1 %v2650_v20  ;;  %2365 = vmatpush3.bf16.msra.mxu0 %v2858_v22 }
 0xcbc   :  { %2370 = vmatprep.subr.bf16.mxu0 %v2650_v20 }
 0xcc0   :  { %v1169_v57 = vpop.permute.xlu1 %1168 }
 0xcc1   :  { %2351 = vmatmul.mubr.msk.bf16.vlgmr.msra.gmra.mrb[20].mxu1 %vm470_vm7, %v1169_v57 }
 0xcc2   :  { %2379 = vmatpush3.bf16.msra.mxu1 %v2770_v49  ;;  %2382 = vmatprep.mubr.msk.bf16.mxu1 %vm2651_vm2, %v2650_v20 }
 0xcc3   :  { %2380 = vmatprep.subr.bf16.mxu1 %v2650_v20 }
 0xcc6   :  { %2381 = vmatpush3.bf16.msra.mxu1 %v2798_v14 }
 0xcc7   :  { %2386 = vmatprep.subr.bf16.mxu1 %v2650_v20 }
 0xd88   :  { %v1274_v58 = vpop.f32.mrb[24].mxu0 }
 0xd89   :  { %v1280_v59 = vadd.f32 %v1274_v58, %v2832_v2  ;;  %v2360_v60 = vpop.f32.mrb[25].mxu0 }
 0xd8a   :  { %v1277_v61 = vpop.f32.mrb[26].mxu0 }
 0xd8b   :  { %v2121_v63 = vmul.f32 -1.442695, %v1280_v59  ;;  %v2361_v1 = vpop.f32.mrb[27].mxu0 }
 0xd8d   :  { %2574 = vpow2.f32 %v2121_v63 }
 0xd8e   :  { %2576 = vtanh.f32 %v1280_v59 }
 0xd94   :  { %v1207_v3 = vpop.f32.mrb[20].mxu1 }
 0xd95   :  { %v2461_v4 = vadd.f32 %v2900_v0, %v1207_v3  ;;  %v2352_v5 = vpop.f32.mrb[21].mxu1 }
 0xd96   :  { %v1210_v7 = vpop.f32.mrb[22].mxu1 }
 0xd97   :  { %v2575_v9 = vpop.eup %2574  ;;  %v2119_v11 = vmul.f32 -1.442695, %v2461_v4  ;;  %v2353_v12 = vpop.f32.mrb[23].mxu1 }
 0xd98   :  { %v1285_v13 = vadd.f32 1.0, %v2575_v9  ;;  %v2577_v15 = vpop.eup %2576 }
 0xd99   :  { %2578 = vpow2.f32 %v2119_v11 }
 0xd9a   :  { %2580 = vrcp.f32 %v1285_v13 }
 0xd9b   :  { %2582 = vtanh.f32 %v2461_v4 }
 0xda3   :  { %v2579_v16 = vpop.eup %2578 }
 0xda4   :  { %v2581_v2 = vpop.eup %2580  ;;  %v1218_v17 = vadd.f32 1.0, %v2579_v16 }
 0xda5   :  { %v1288_v18 = vsel %vm2838_vm6, %v2577_v15, %v2581_v2  ;;  %v2583_v19 = vpop.eup %2582 }
 0xda6   :  { %2584 = vrcp.f32 %v1218_v17  ;;  %1291 = vrot.lane.b32.xlu0 %v1288_v18, %s2652_s15  ;;  %v1289_v56 = vmul.f32 %v1288_v18, %v2997_v41 }
 0xdb0   :  { %v2585_v23 = vpop.eup %2584 }
 0xdb1   :  { %v1221_v24 = vsel %vm2838_vm6, %v2583_v19, %v2585_v23 }
 0xdb2   :  { %1224 = vrot.lane.b32.xlu1 %v1221_v24, %s2652_s15  ;;  %v1222_v33 = vmul.f32 %v1221_v24, %v3001_v45 }
 0xe18   :  { %v1292_v25 = vpop.permute.xlu0 %1291 }
 0xe19   :  { %v1294_v26 = vmul.f32 %v1292_v25, %v1288_v18 }
 0xe1b   :  { %1296 = vrot.lane.b32.xlu0 %v1294_v26, %s2653_s16 }
 0xe24   :  { %v1225_v28 = vpop.permute.xlu1 %1224 }
 0xe25   :  { %v1227_v30 = vmul.f32 %v1225_v28, %v1221_v24 }
 0xe27   :  { %1229 = vrot.lane.b32.xlu1 %v1227_v30, %s2653_s16 }
 0xe8d   :  { %v1297_v31 = vpop.permute.xlu0 %1296 }
 0xe8e   :  { %v3040_v32 = vadd.f32 %v1297_v31, %v1289_v56 }
 0xe90   :  { %2586 = vtanh.f32 %v3040_v32 }
 0xe99   :  { %v1230_v34 = vpop.permute.xlu1 %1229 }
 0xe9a   :  { %v2587_v35 = vpop.eup %2586  ;;  %v3044_v36 = vadd.f32 %v1230_v34, %v1222_v33  ;;  %v2646_v34 = vld [vmem:[%s3207_s4] sm:$0xff]  }
 0xe9b   :  { %1302 = vrot.lane.b32.xlu0 %v2587_v35, %s2652_s15 }
 0xe9c   :  { %2588 = vtanh.f32 %v3044_v36 }
 0xea6   :  { %v2589_v37 = vpop.eup %2588 }
 0xea7   :  { %1235 = vrot.lane.b32.xlu1 %v2589_v37, %s2652_s15 }
 0xf0d   :  { %v1303_v38 = vpop.permute.xlu0 %1302 }
 0xf0e   :  { %v1305_v52 = vmul.f32 %v1303_v38, %v1288_v18 }
 0xf10   :  { %v1306_v39 = vpack.c.bf16 %v1305_v52, %v1305_v52 }
 0xf12   :  { %1308 = vrot.lane.b32.xlu0 %v1306_v39, %s2653_s16 }
 0xf19   :  { %v1236_v40 = vpop.permute.xlu1 %1235 }
 0xf1a   :  { %v1238_v41 = vmul.f32 %v1236_v40, %v1221_v24 }
 0xf1c   :  { %v1239_v42 = vpack.c.bf16 %v1238_v41, %v1238_v41 }
 0xf1e   :  { %1354 = vrot.lane.b32.xlu1 %v1239_v42, %s2653_s16 }
 0xf84   :  { %v1309_v43 = vpop.permute.xlu0 %1308 }
 0xf85   :  { %2367 = vmatmul.mubr.msk.bf16.vlgmr.msra.gmra.mrb[28].mxu0 %vm470_vm7, %v1309_v43  ;;  %2383 = vmatmul.mubr.msk.bf16.vlgmr.msra.gmra.mrb[24].mxu1 %vm470_vm7, %v1309_v43 }
 0xf86   :  { %2371 = vmatpush3.bf16.msra.mxu0 %v2868_v27  ;;  %2374 = vmatprep.mubr.msk.bf16.mxu0 %vm2651_vm2, %v2650_v20 }
 0xf87   :  { %2372 = vmatprep.subr.bf16.mxu0 %v2650_v20  ;;  %2387 = vmatpush3.bf16.msra.mxu1 %v2852_v21 }
 0xf88   :  { %2388 = vmatprep.subr.bf16.mxu1 %v2650_v20  ;;  %2390 = vmatprep.mubr.msk.bf16.mxu1 %vm2651_vm2, %v2650_v20 }
 0xf8a   :  { %2373 = vmatpush3.bf16.msra.mxu0 %v2876_v29 }
 0xf8b   :  { %2402 = vmatprep.subr.bf16.mxu0 %v2650_v20  ;;  %2389 = vmatpush3.bf16.msra.mxu1 %v2858_v22 }
 0xf8c   :  { %2394 = vmatprep.subr.bf16.mxu1 %v2650_v20 }
 0xf90   :  { %v1355_v44 = vpop.permute.xlu1 %1354 }
 0xf91   :  { %2375 = vmatmul.mubr.msk.bf16.vlgmr.msra.gmra.mrb[28].mxu0 %vm470_vm7, %v1355_v44 }
 0xf92   :  { %2403 = vmatpush3.bf16.msra.mxu0 %v2770_v49  ;;  %2406 = vmatprep.mubr.msk.bf16.mxu0 %vm2651_vm2, %v2650_v20 }
 0xf93   :  { %2404 = vmatprep.subr.bf16.mxu0 %v2650_v20 }
 0xf96   :  { %2405 = vmatpush3.bf16.msra.mxu0 %v2798_v14 }
 0xf97   :  { %2410 = vmatprep.subr.bf16.mxu0 %v2650_v20 }
0x1058   :  { %v1460_v45 = vpop.f32.mrb[24].mxu1 }
0x1059   :  { %v1466_v46 = vadd.f32 %v1460_v45, %v2836_v8  ;;  %v2384_v47 = vpop.f32.mrb[25].mxu1 }
0x105a   :  { %v1463_v48 = vpop.f32.mrb[26].mxu1 }
0x105b   :  { %v2126_v50 = vmul.f32 -1.442695, %v1466_v46  ;;  %v2385_v51 = vpop.f32.mrb[27].mxu1 }
0x105d   :  { %2590 = vpow2.f32 %v2126_v50 }
0x105e   :  { %2592 = vtanh.f32 %v1466_v46 }
0x1064   :  { %v1393_v53 = vpop.f32.mrb[28].mxu0 }
0x1065   :  { %v2462_v49 = vadd.f32 %v2900_v0, %v1393_v53  ;;  %v2376_v54 = vpop.f32.mrb[29].mxu0 }
0x1066   :  { %v1396_v55 = vpop.f32.mrb[30].mxu0 }
0x1067   :  { %v2591_v57 = vpop.eup %2590  ;;  %v2124_v58 = vmul.f32 -1.442695, %v2462_v49  ;;  %v2377_v59 = vpop.f32.mrb[31].mxu0 }
0x1068   :  { %v1471_v60 = vadd.f32 1.0, %v2591_v57  ;;  %v2593_v61 = vpop.eup %2592 }
0x1069   :  { %2594 = vpow2.f32 %v2124_v58 }
0x106a   :  { %2596 = vrcp.f32 %v1471_v60 }
0x106b   :  { %2598 = vtanh.f32 %v2462_v49 }
0x1073   :  { %v2595_v63 = vpop.eup %2594 }
0x1074   :  { %v2597_v8 = vpop.eup %2596  ;;  %v1404_v1 = vadd.f32 1.0, %v2595_v63 }
0x1075   :  { %v1474_v3 = vsel %vm2838_vm6, %v2593_v61, %v2597_v8  ;;  %v2599_v4 = vpop.eup %2598 }
0x1076   :  { %2600 = vrcp.f32 %v1404_v1  ;;  %1477 = vrot.lane.b32.xlu0 %v1474_v3, %s2652_s15  ;;  %v1475_v15 = vmul.f32 %v1474_v3, %v3040_v32 }
0x1080   :  { %v2601_v5 = vpop.eup %2600 }
0x1081   :  { %v1407_v7 = vsel %vm2838_vm6, %v2599_v4, %v2601_v5 }
0x1082   :  { %1410 = vrot.lane.b32.xlu1 %v1407_v7, %s2652_s15  ;;  %v1408_v17 = vmul.f32 %v1407_v7, %v3044_v36 }
0x10e8   :  { %v1478_v9 = vpop.permute.xlu0 %1477 }
0x10e9   :  { %v1480_v11 = vmul.f32 %v1478_v9, %v1474_v3 }
0x10eb   :  { %1482 = vrot.lane.b32.xlu0 %v1480_v11, %s2653_s16 }
0x10f4   :  { %v1411_v12 = vpop.permute.xlu1 %1410 }
0x10f5   :  { %v1413_v13 = vmul.f32 %v1411_v12, %v1407_v7 }
0x10f7   :  { %1415 = vrot.lane.b32.xlu1 %v1413_v13, %s2653_s16 }
0x115d   :  { %v1483_v16 = vpop.permute.xlu0 %1482 }
0x115e   :  { %v3083_v2 = vadd.f32 %v1483_v16, %v1475_v15 }
0x1160   :  { %2602 = vtanh.f32 %v3083_v2 }
0x1169   :  { %v1416_v18 = vpop.permute.xlu1 %1415 }
0x116a   :  { %v2603_v19 = vpop.eup %2602  ;;  %v3087_v23 = vadd.f32 %v1416_v18, %v1408_v17 }
0x116b   :  { %1488 = vrot.lane.b32.xlu0 %v2603_v19, %s2652_s15 }
0x116c   :  { %2604 = vtanh.f32 %v3087_v23 }
0x1176   :  { %v2605_v24 = vpop.eup %2604 }
0x1177   :  { %1421 = vrot.lane.b32.xlu1 %v2605_v24, %s2652_s15 }
0x11dd   :  { %v1489_v25 = vpop.permute.xlu0 %1488 }
0x11de   :  { %v1491_v26 = vmul.f32 %v1489_v25, %v1474_v3 }
0x11e0   :  { %v1492_v28 = vpack.c.bf16 %v1491_v26, %v1491_v26 }
0x11e2   :  { %1494 = vrot.lane.b32.xlu0 %v1492_v28, %s2653_s16 }
0x11e9   :  { %v1422_v30 = vpop.permute.xlu1 %1421 }
0x11ea   :  { %v1424_v56 = vmul.f32 %v1422_v30, %v1407_v7 }
0x11ec   :  { %v1425_v31 = vpack.c.bf16 %v1424_v56, %v1424_v56 }
0x11ee   :  { %1540 = vrot.lane.b32.xlu1 %v1425_v31, %s2653_s16 }
0x1254   :  { %v1495_v32 = vpop.permute.xlu0 %1494 }
0x1255   :  { %2391 = vmatmul.mubr.msk.bf16.vlgmr.msra.gmra.mrb[28].mxu1 %vm470_vm7, %v1495_v32  ;;  %2407 = vmatmul.mubr.msk.bf16.vlgmr.msra.gmra.mrb[32].mxu0 %vm470_vm7, %v1495_v32 }
0x1256   :  { %2395 = vmatpush3.bf16.msra.mxu1 %v2868_v27  ;;  %2398 = vmatprep.mubr.msk.bf16.mxu1 %vm2651_vm2, %v2650_v20 }
0x1257   :  { %2396 = vmatprep.subr.bf16.mxu1 %v2650_v20  ;;  %2411 = vmatpush3.bf16.msra.mxu0 %v2852_v21 }
0x1258   :  { %2412 = vmatprep.subr.bf16.mxu0 %v2650_v20  ;;  %2414 = vmatprep.mubr.msk.bf16.mxu0 %vm2651_vm2, %v2650_v20 }
0x125a   :  { %2397 = vmatpush3.bf16.msra.mxu1 %v2876_v29 }
0x125b   :  { %2426 = vmatprep.subr.bf16.mxu1 %v2650_v20  ;;  %2413 = vmatpush3.bf16.msra.mxu0 %v2858_v22 }
0x125c   :  { %2418 = vmatprep.subr.bf16.mxu0 %v2650_v20 }
0x1260   :  { %v1541_v33 = vpop.permute.xlu1 %1540 }
0x1261   :  { %2399 = vmatmul.mubr.msk.bf16.vlgmr.msra.gmra.mrb[28].mxu1 %vm470_vm7, %v1541_v33 }
0x1262   :  { %2427 = vmatpush3.bf16.msra.mxu1 %v2646_v34  ;;  %2430 = vmatprep.mubr.msk.bf16.mxu1 %vm2651_vm2, %v2650_v20 }
0x1263   :  { %2428 = vmatprep.subr.bf16.mxu1 %v2650_v20 }
0x1266   :  { %2429 = vmatpush3.bf16.msra.mxu1 %v2798_v14 }
0x1267   :  { %2434 = vmatprep.subr.bf16.mxu1 %v2650_v20 }
0x1328   :  { %v1646_v35 = vpop.f32.mrb[32].mxu0 }
0x1329   :  { %v1652_v36 = vadd.f32 %v1646_v35, %v2830_v62  ;;  %v2408_v37 = vpop.f32.mrb[33].mxu0 }
0x132a   :  { %v1649_v38 = vpop.f32.mrb[34].mxu0 }
0x132b   :  { %v2131_v52 = vmul.f32 -1.442695, %v1652_v36  ;;  %v2409_v39 = vpop.f32.mrb[35].mxu0 }
0x132d   :  { %2606 = vpow2.f32 %v2131_v52 }
0x132e   :  { %2608 = vtanh.f32 %v1652_v36 }
0x1334   :  { %v1579_v40 = vpop.f32.mrb[28].mxu1 }
0x1335   :  { %v2463_v41 = vadd.f32 %v2900_v0, %v1579_v40  ;;  %v2400_v42 = vpop.f32.mrb[29].mxu1 }
0x1336   :  { %v1582_v43 = vpop.f32.mrb[30].mxu1 }
0x1337   :  { %v2607_v44 = vpop.eup %2606  ;;  %v2129_v45 = vmul.f32 -1.442695, %v2463_v41  ;;  %v2401_v46 = vpop.f32.mrb[31].mxu1 }
0x1338   :  { %v1657_v14 = vadd.f32 1.0, %v2607_v44  ;;  %v2609_v47 = vpop.eup %2608 }
0x1339   :  { %2610 = vpow2.f32 %v2129_v45 }
0x133a   :  { %2612 = vrcp.f32 %v1657_v14 }
0x133b   :  { %2614 = vtanh.f32 %v2463_v41 }
0x1343   :  { %v2611_v48 = vpop.eup %2610 }
0x1344   :  { %v2613_v62 = vpop.eup %2612  ;;  %v1590_v50 = vadd.f32 1.0, %v2611_v48 }
0x1345   :  { %v1660_v51 = vsel %vm2838_vm6, %v2609_v47, %v2613_v62  ;;  %v2615_v53 = vpop.eup %2614 }
0x1346   :  { %2616 = vrcp.f32 %v1590_v50  ;;  %1663 = vrot.lane.b32.xlu0 %v1660_v51, %s2652_s15  ;;  %v1661_v60 = vmul.f32 %v1660_v51, %v3083_v2 }
0x1350   :  { %v2617_v49 = vpop.eup %2616 }
0x1351   :  { %v1593_v54 = vsel %vm2838_vm6, %v2615_v53, %v2617_v49 }
0x1352   :  { %1596 = vrot.lane.b32.xlu1 %v1593_v54, %s2652_s15  ;;  %v1594_v8 = vmul.f32 %v1593_v54, %v3087_v23 }
0x13b8   :  { %v1664_v55 = vpop.permute.xlu0 %1663 }
0x13b9   :  { %v1666_v57 = vmul.f32 %v1664_v55, %v1660_v51  ;;  %v2647_v55 = vld [vmem:[%s3207_s4 + $0x10] sm:$0xff]  }
0x13bb   :  { %1668 = vrot.lane.b32.xlu0 %v1666_v57, %s2653_s16  ;;  %v2648_v57 = vld [vmem:[%s3207_s4 + $0x18] sm:$0xff]  }
0x13c4   :  { %v1597_v58 = vpop.permute.xlu1 %1596 }
0x13c5   :  { %v1599_v59 = vmul.f32 %v1597_v58, %v1593_v54 }
0x13c7   :  { %1601 = vrot.lane.b32.xlu1 %v1599_v59, %s2653_s16 }
0x142d   :  { %v1669_v61 = vpop.permute.xlu0 %1668 }
0x142e   :  { %v3128_v63 = vadd.f32 %v1669_v61, %v1661_v60 }
0x1430   :  { %2618 = vtanh.f32 %v3128_v63 }
0x1439   :  { %v1602_v1 = vpop.permute.xlu1 %1601 }
0x143a   :  { %v2619_v3 = vpop.eup %2618  ;;  %v3132_v4 = vadd.f32 %v1602_v1, %v1594_v8 }
0x143b   :  { %1674 = vrot.lane.b32.xlu0 %v2619_v3, %s2652_s15 }
0x143c   :  { %2620 = vtanh.f32 %v3132_v4 }
0x1446   :  { %v2621_v5 = vpop.eup %2620 }
0x1447   :  { %1607 = vrot.lane.b32.xlu1 %v2621_v5, %s2652_s15 }
0x14ad   :  { %v1675_v7 = vpop.permute.xlu0 %1674 }
0x14ae   :  { %v1677_v9 = vmul.f32 %v1675_v7, %v1660_v51 }
0x14b0   :  { %v1678_v11 = vpack.c.bf16 %v1677_v9, %v1677_v9 }
0x14b2   :  { %1680 = vrot.lane.b32.xlu0 %v1678_v11, %s2653_s16 }
0x14b9   :  { %v1608_v12 = vpop.permute.xlu1 %1607 }
0x14ba   :  { %v1610_v13 = vmul.f32 %v1608_v12, %v1593_v54 }
0x14bc   :  { %v1611_v15 = vpack.c.bf16 %v1610_v13, %v1610_v13 }
0x14be   :  { %1726 = vrot.lane.b32.xlu1 %v1611_v15, %s2653_s16 }
0x1524   :  { %v1681_v16 = vpop.permute.xlu0 %1680 }
0x1525   :  { %2415 = vmatmul.mubr.msk.bf16.vlgmr.msra.gmra.mrb[36].mxu0 %vm470_vm7, %v1681_v16  ;;  %2431 = vmatmul.mubr.msk.bf16.vlgmr.msra.gmra.mrb[32].mxu1 %vm470_vm7, %v1681_v16  ;;  %v2516_v16 = vld [vmem:[%s3210_s5] sm:$0xff]  }
0x1526   :  { %2419 = vmatpush3.bf16.msra.mxu0 %v2868_v27  ;;  %2422 = vmatprep.mubr.msk.bf16.mxu0 %vm2651_vm2, %v2650_v20 }
0x1527   :  { %2420 = vmatprep.subr.bf16.mxu0 %v2650_v20  ;;  %2435 = vmatpush3.bf16.msra.mxu1 %v2852_v21 }
0x1528   :  { %2436 = vmatprep.subr.bf16.mxu1 %v2650_v20  ;;  %2438 = vmatprep.mubr.msk.bf16.mxu1 %vm2651_vm2, %v2650_v20 }
0x152a   :  { %2421 = vmatpush3.bf16.msra.mxu0 %v2876_v29 }
0x152b   :  { %2437 = vmatpush3.bf16.msra.mxu1 %v2858_v22  ;;  %2450 = vmatprep.subr.bf16.mxu0 %v2650_v20 }
0x152c   :  { %2442 = vmatprep.subr.bf16.mxu1 %v2650_v20 }
0x1530   :  { %v1727_v27 = vpop.permute.xlu1 %1726 }
0x1531   :  { %2423 = vmatmul.mubr.msk.bf16.vlgmr.msra.gmra.mrb[36].mxu0 %vm470_vm7, %v1727_v27 }
0x1532   :  { %2454 = vmatprep.mubr.msk.bf16.mxu0 %vm2651_vm2, %v2650_v20  ;;  %2451 = vmatpush3.bf16.msra.mxu0 %v2516_v16 }
0x1533   :  { %2452 = vmatprep.subr.bf16.mxu0 %v2650_v20 }
0x1536   :  { %2453 = vmatpush3.bf16.msra.mxu0 %v2517_v10 }
0x15f8   :  { %v1832_v21 = vpop.f32.mrb[32].mxu1 }
0x15f9   :  { %v1838_v2 = vadd.f32 %v1832_v21, %v2834_v6  ;;  %v2432_v17 = vpop.f32.mrb[33].mxu1 }
0x15fa   :  { %v1835_v18 = vpop.f32.mrb[34].mxu1 }
0x15fb   :  { %v2136_v19 = vmul.f32 -1.442695, %v1838_v2  ;;  %v2433_v23 = vpop.f32.mrb[35].mxu1 }
0x15fd   :  { %2622 = vpow2.f32 %v2136_v19  ;;  %v2140_v19 = vld [vmem:[%s3209_s6 + $0x1] ss:$0 sm:$0xff] }
0x15fe   :  { %2624 = vtanh.f32 %v1838_v2 }
0x1604   :  { %v1765_v29 = vpop.f32.mrb[36].mxu0 }
0x1605   :  { %v2464_v22 = vadd.f32 %v2900_v0, %v1765_v29  ;;  %v2424_v24 = vpop.f32.mrb[37].mxu0 }
0x1606   :  { %v1768_v25 = vpop.f32.mrb[38].mxu0 }
0x1607   :  { %v2623_v26 = vpop.eup %2622  ;;  %v2134_v28 = vmul.f32 -1.442695, %v2464_v22  ;;  %v2425_v30 = vpop.f32.mrb[39].mxu0 }
0x1608   :  { %v1843_v56 = vadd.f32 1.0, %v2623_v26  ;;  %v2625_v31 = vpop.eup %2624 }
0x1609   :  { %2626 = vpow2.f32 %v2134_v28 }
0x160a   :  { %2628 = vrcp.f32 %v1843_v56 }
0x160b   :  { %2630 = vtanh.f32 %v2464_v22 }
0x1613   :  { %v2627_v32 = vpop.eup %2626 }
0x1614   :  { %v2629_v6 = vpop.eup %2628  ;;  %v1776_v33 = vadd.f32 1.0, %v2627_v32 }
0x1615   :  { %v1846_v34 = vsel %vm2838_vm6, %v2625_v31, %v2629_v6  ;;  %v2631_v35 = vpop.eup %2630 }
0x1616   :  { %2632 = vrcp.f32 %v1776_v33  ;;  %1849 = vrot.lane.b32.xlu0 %v1846_v34, %s2652_s15  ;;  %v1847_v41 = vmul.f32 %v1846_v34, %v3128_v63 }
0x1620   :  { %v2633_v36 = vpop.eup %2632 }
0x1621   :  { %v1779_v37 = vsel %vm2838_vm6, %v2631_v35, %v2633_v36 }
0x1622   :  { %1782 = vrot.lane.b32.xlu1 %v1779_v37, %s2652_s15  ;;  %v1780_v44 = vmul.f32 %v1779_v37, %v3132_v4 }
0x1688   :  { %v1850_v38 = vpop.permute.xlu0 %1849 }
0x1689   :  { %v1852_v52 = vmul.f32 %v1850_v38, %v1846_v34 }
0x168b   :  { %1854 = vrot.lane.b32.xlu0 %v1852_v52, %s2653_s16 }
0x1694   :  { %v1783_v39 = vpop.permute.xlu1 %1782 }
0x1695   :  { %v1785_v40 = vmul.f32 %v1783_v39, %v1779_v37 }
0x1697   :  { %1787 = vrot.lane.b32.xlu1 %v1785_v40, %s2653_s16 }
0x16fd   :  { %v1855_v42 = vpop.permute.xlu0 %1854 }
0x16fe   :  { %v1857_v43 = vadd.f32 %v1855_v42, %v1847_v41 }
0x1700   :  { %2634 = vtanh.f32 %v1857_v43 }
0x1709   :  { %v1788_v45 = vpop.permute.xlu1 %1787 }
0x170a   :  { %v2635_v46 = vpop.eup %2634  ;;  %v1790_v14 = vadd.f32 %v1788_v45, %v1780_v44 }
0x170b   :  { %1860 = vrot.lane.b32.xlu0 %v2635_v46, %s2652_s15 }
0x170c   :  { %2636 = vtanh.f32 %v1790_v14 }
0x1716   :  { %v2637_v47 = vpop.eup %2636 }
0x1717   :  { %1793 = vrot.lane.b32.xlu1 %v2637_v47, %s2652_s15 }
0x177d   :  { %v1861_v48 = vpop.permute.xlu0 %1860 }
0x177e   :  { %v1863_v62 = vmul.f32 %v1861_v48, %v1846_v34 }
0x1780   :  { %v1864_v50 = vpack.c.bf16 %v1863_v62, %v1863_v62 }
0x1782   :  { %1866 = vrot.lane.b32.xlu0 %v1864_v50, %s2653_s16 }
0x1789   :  { %v1794_v51 = vpop.permute.xlu1 %1793 }
0x178a   :  { %v1796_v53 = vmul.f32 %v1794_v51, %v1779_v37 }
0x178c   :  { %v1797_v49 = vpack.c.bf16 %v1796_v53, %v1796_v53 }
0x178e   :  { %1912 = vrot.lane.b32.xlu1 %v1797_v49, %s2653_s16 }
0x17f4   :  { %v1867_v54 = vpop.permute.xlu0 %1866 }
0x17f5   :  { %2439 = vmatmul.mubr.msk.bf16.vlgmr.msra.gmra.mrb[36].mxu1 %vm470_vm7, %v1867_v54 }
0x17f6   :  { %2443 = vmatpush3.bf16.msra.mxu1 %v2647_v55  ;;  %2446 = vmatprep.mubr.msk.bf16.mxu1 %vm2651_vm2, %v2650_v20 }
0x17f7   :  { %2444 = vmatprep.subr.bf16.mxu1 %v2650_v20 }
0x17fa   :  { %2445 = vmatpush3.bf16.msra.mxu1 %v2648_v57 }
0x1800   :  { %v1913_v58 = vpop.permute.xlu1 %1912 }
0x1801   :  { %2447 = vmatmul.mubr.msk.bf16.vlgmr.msra.gmra.mrb[36].mxu1 %vm470_vm7, %v1913_v58 }
0x18d4   :  { %v1951_v59 = vpop.f32.mrb[36].mxu1 }
0x18d5   :  { %v2465_v60 = vadd.f32 %v2900_v0, %v1951_v59  ;;  %v2448_v61 = vpop.f32.mrb[37].mxu1 }
0x18d6   :  { %v1954_v63 = vpop.f32.mrb[38].mxu1 }
0x18d7   :  { %v2139_v8 = vmul.f32 -1.442695, %v2465_v60  ;;  %v2449_v1 = vpop.f32.mrb[39].mxu1 }
0x18d9   :  { %2638 = vpow2.f32 %v2139_v8 }
0x18da   :  { %2640 = vtanh.f32 %v2465_v60 }
0x18e3   :  { %v2639_v3 = vpop.eup %2638 }
0x18e4   :  { %v1962_v4 = vadd.f32 1.0, %v2639_v3  ;;  %v2641_v5 = vpop.eup %2640 }
0x18e6   :  { %2642 = vrcp.f32 %v1962_v4 }
0x18f0   :  { %v2643_v7 = vpop.eup %2642 }
0x18f1   :  { %v1965_v9 = vsel %vm2838_vm6, %v2641_v5, %v2643_v7 }
0x18f2   :  { %1968 = vrot.lane.b32.xlu0 %v1965_v9, %s2652_s15  ;;  %v1966_v0 = vmul.f32 %v1965_v9, %v1790_v14 }
0x1964   :  { %v1969_v11 = vpop.permute.xlu0 %1968 }
0x1965   :  { %v1971_v12 = vmul.f32 %v1969_v11, %v1965_v9 }
0x1967   :  { %1973 = vrot.lane.b32.xlu1 %v1971_v12, %s2653_s16 }
0x19d9   :  { %v1974_v13 = vpop.permute.xlu1 %1973 }
0x19da   :  { %v1976_v15 = vadd.f32 %v1974_v13, %v1966_v0 }
0x19dc   :  { %2644 = vtanh.f32 %v1976_v15 }
0x19e6   :  { %v2645_v27 = vpop.eup %2644 }
0x19e7   :  { %1979 = vrot.lane.b32.xlu0 %v2645_v27, %s2652_s15 }
0x1a59   :  { %v1980_v21 = vpop.permute.xlu0 %1979 }
0x1a5a   :  { %v1982_v2 = vmul.f32 %v1980_v21, %v1965_v9 }
0x1a5c   :  { %v1983_v17 = vpack.c.bf16 %v1982_v2, %v1982_v2 }
0x1a5e   :  { %1994 = vrot.lane.b32.xlu1 %v1983_v17, %s2653_s16 }
0x1ad0   :  { %v1995_v18 = vpop.permute.xlu1 %1994 }
0x1ad1   :  { %2455 = vmatmul.mubr.msk.bf16.vlgmr.msra.gmra.mrb[40].mxu0 %vm470_vm7, %v1995_v18 }
0x1ba4   :  { %v2045_v23 = vpop.f32.mrb[40].mxu0 }
0x1ba5   :  { %v2046_v29 = vadd.f32 %v2140_v19, %v2045_v23  ;;  %v2456_v20 = vpop.f32.mrb[41].mxu0 }
0x1ba6   :  { %v2048_v22 = vpop.f32.mrb[42].mxu0 }
0x1ba7   :  { %2052 = vst.msk [vmem:[%s3211_s7] sm:$0xff] %vm2051_vm8, %v2046_v29  ;;  %v2457_v24 = vpop.f32.mrb[43].mxu0 }

</bundles_post_ra>
